<compile_context>
chip_gen: v7x
topology: tpu7x:2x2x1
jax: 0.10.0
libtpu: 0.0.40
codegen_flags: <defaults>
</compile_context>

<pallas_src>
import jax
import jax.numpy as jnp
from jax.experimental import pallas as pl
from jax.experimental.pallas import tpu as pltpu


def fused_lstm2_wavefront_kernel(x_ref, wih0_ref, b0_ref, w_ref, b1_ref, out_ref):
    """Two stacked LSTM layers, wavefront-scheduled, in one kernel.

    x_ref:    (T*B, D)   time-major flattened input (row t*B + b == x[b, t, :])
    wih0_ref: (D, 4H)    layer-0 input->gates weight (transposed, g-cols x2)
    b0_ref:   (1, 4H)    layer-0 folded bias (b_ih + b_hh, g-slice x2)
    w_ref:    (2H, 8H)   fused recurrent RHS [[whh0^T, wih1^T], [0, whh1^T]]
    b1_ref:   (1, 4H)    layer-1 folded bias (g-slice x2)
    out_ref:  (B, T*H)   lane-dense slab of top-layer hidden states
    Gate order matches PyTorch: i, f, g, o.
    """
    B = out_ref.shape[0]
    H = w_ref.shape[0] // 2
    G = 4 * H
    T = out_ref.shape[1] // H

    # Hoisted layer-0 input projection (+ folded bias): one MXU push.
    gx0 = (jnp.dot(x_ref[...], wih0_ref[...],
                   preferred_element_type=jnp.float32)
           + b0_ref[...])                                        # (T*B, 4H)

    w = w_ref[...]                                               # (2H, 8H)
    b1 = b1_ref[...]                                             # (1, 4H)

    def cell(gates, c):
        # gates: (B, 4H). The g-gate columns were pre-scaled by 2, so the
        # single full-vreg sigmoid also yields tanh via 2*sigmoid(2z) - 1.
        sig = jax.nn.sigmoid(gates)
        i_g = sig[:, 0 * H:1 * H]
        f_g = sig[:, 1 * H:2 * H]
        g_g = 2.0 * sig[:, 2 * H:3 * H] - 1.0
        o_g = sig[:, 3 * H:4 * H]
        c_new = f_g * c + i_g * g_g
        h_new = o_g * jnp.tanh(c_new)
        return h_new, c_new

    h0 = jnp.zeros((B, H), jnp.float32)
    c0 = jnp.zeros((B, H), jnp.float32)
    h1 = jnp.zeros((B, H), jnp.float32)
    c1 = jnp.zeros((B, H), jnp.float32)

    # Clock 0: layer-0 step 0 only (zero initial state -> recurrent term is 0).
    h0, c0 = cell(gx0[0:B, :], c0)

    # Wavefront clocks 1..T: layer-0 step k and layer-1 step k-1 share one
    # merged (B, 2H) x (2H, 8H) matmul computed from the PRE-update h0 / h1.
    for k in range(1, T + 1):
        lhs = jnp.concatenate([h0, h1], axis=1)                  # (B, 2H)
        rec = jnp.dot(lhs, w, preferred_element_type=jnp.float32)  # (B, 8H)
        if k < T:
            h0, c0 = cell(gx0[k * B:(k + 1) * B, :] + rec[:, 0:G], c0)
        h1, c1 = cell(rec[:, G:2 * G] + b1, c1)
        # Direct lane placement of layer-1 step k-1 into the output slab.
        out_ref[:, (k - 1) * H:k * H] = h1.astype(out_ref.dtype)


def lstm_module_forward(x, prepared_params):
    """forward(x) of LSTMModule using the fused wavefront Pallas kernel."""
    wih0_t, b0, w_fused, b1 = prepared_params
    B, T, D = x.shape
    H = w_fused.shape[0] // 2
    G = 4 * H
    # Time-major flatten in the wrapper (layout plumbing, free for XLA):
    # row t*B + b holds x[b, t, :].
    x_tb = jnp.transpose(x, (1, 0, 2)).reshape(T * B, D)

    out_2d = pl.pallas_call(
        fused_lstm2_wavefront_kernel,
        out_shape=jax.ShapeDtypeStruct((B, T * H), x.dtype),
        grid=(1,),
        in_specs=[
            pl.BlockSpec((T * B, D), lambda i: (0, 0)),
            pl.BlockSpec((D, G), lambda i: (0, 0)),
            pl.BlockSpec((1, G), lambda i: (0, 0)),
            pl.BlockSpec((2 * H, 2 * G), lambda i: (0, 0)),
            pl.BlockSpec((1, G), lambda i: (0, 0)),
        ],
        out_specs=pl.BlockSpec((B, T * H), lambda i: (0, 0)),
        compiler_params=pltpu.CompilerParams(
            dimension_semantics=("arbitrary",)),
    )(x_tb, wih0_t, b0, w_fused, b1)

    # Lane-dense (B, T*H) slab -> (B, T, H); contiguous reshape, free in XLA.
    return out_2d.reshape(B, T, H)


def init_lstm_params(key, input_size, hidden_size, num_layers):
    """Deterministic init mimicking nn.LSTM (uniform(-1/sqrt(H), 1/sqrt(H)))."""
    params = []
    bound = 1.0 / jnp.sqrt(jnp.float32(hidden_size))
    for layer in range(num_layers):
        d_in = input_size if layer == 0 else hidden_size
        key, k1, k2, k3, k4 = jax.random.split(key, 5)
        w_ih = jax.random.uniform(k1, (4 * hidden_size, d_in), jnp.float32, -bound, bound)
        w_hh = jax.random.uniform(k2, (4 * hidden_size, hidden_size), jnp.float32, -bound, bound)
        b_ih = jax.random.uniform(k3, (4 * hidden_size,), jnp.float32, -bound, bound)
        b_hh = jax.random.uniform(k4, (4 * hidden_size,), jnp.float32, -bound, bound)
        params.append((w_ih, w_hh, b_ih, b_hh))
    return params


def prepare_params(params):
    """One-time prep (outside forward): transpose weights, fold biases, scale
    the g-gate columns by 2 (for the 2*sigmoid-1 tanh trick) and assemble the
    fused block-diagonal recurrent RHS for the wavefront step."""
    (w_ih0, w_hh0, b_ih0, b_hh0), (w_ih1, w_hh1, b_ih1, b_hh1) = params
    H = w_hh0.shape[1]
    G = 4 * H

    def scale_g_cols(w_t):                    # w_t: (K, 4H)
        return w_t.at[:, 2 * H:3 * H].multiply(2.0)

    def scale_g_bias(b):                      # b: (4H,)
        return b.at[2 * H:3 * H].multiply(2.0)

    wih0_t = scale_g_cols(jnp.transpose(w_ih0))                  # (D, 4H)
    b0 = scale_g_bias(b_ih0 + b_hh0).reshape(1, G)

    whh0_t = scale_g_cols(jnp.transpose(w_hh0))                  # (H, 4H)
    wih1_t = scale_g_cols(jnp.transpose(w_ih1))                  # (H, 4H)
    whh1_t = scale_g_cols(jnp.transpose(w_hh1))                  # (H, 4H)
    b1 = scale_g_bias(b_ih1 + b_hh1).reshape(1, G)

    # [h0_{k-1} | h1_{k-2}] @ [[whh0^T, wih1^T],
    #                          [   0  , whh1^T]]   -> (B, 8H)
    w_fused = jnp.concatenate(
        [jnp.concatenate([whh0_t, wih1_t], axis=1),
         jnp.concatenate([jnp.zeros_like(whh1_t), whh1_t], axis=1)],
        axis=0)                                                  # (2H, 8H)

    return wih0_t, b0, w_fused, b1


def lstm_module_forward_ref(x, params):
    """Pure-JAX reference (PyTorch gate order i, f, g, o)."""
    out = x
    for (w_ih, w_hh, b_ih, b_hh) in params:
        B, T, _ = out.shape
        H = w_hh.shape[1]
        h = jnp.zeros((B, H), jnp.float32)
        c = jnp.zeros((B, H), jnp.float32)
        hs = []
        for t in range(T):
            gates = out[:, t, :] @ w_ih.T + h @ w_hh.T + b_ih + b_hh
            i_g = jax.nn.sigmoid(gates[:, 0 * H:1 * H])
            f_g = jax.nn.sigmoid(gates[:, 1 * H:2 * H])
            g_g = jnp.tanh(gates[:, 2 * H:3 * H])
            o_g = jax.nn.sigmoid(gates[:, 3 * H:4 * H])
            c = f_g * c + i_g * g_g
            h = o_g * jnp.tanh(c)
            hs.append(h)
        out = jnp.stack(hs, axis=1)
    return out


if __name__ == "__main__":
    # Small shapes consistent with the module's forward:
    input_size, sequence_length, lstm_hidden_size = 4, 8, 32
    batch = 2
    num_layers = 2

    key = jax.random.PRNGKey(0)
    key, xkey = jax.random.split(key)
    x = jax.random.normal(xkey, (batch, sequence_length, input_size), jnp.float32)

    params = init_lstm_params(key, input_size, lstm_hidden_size, num_layers)
    prepared = prepare_params(params)

    emb = lstm_module_forward(x, prepared)
    emb = jax.block_until_ready(emb)

    ref = lstm_module_forward_ref(x, params)
    assert emb.shape == (batch, sequence_length, lstm_hidden_size)
    assert jnp.allclose(emb, ref, atol=1e-4, rtol=1e-4), float(jnp.abs(emb - ref).max())

    print("KERNEL_OK")
</pallas_src>

<mosaic_0001>
module attributes {stable_mosaic.version = 11 : i64} {
  func.func @fused_lstm2_wavefront_kernel(%arg0: i32, %arg1: memref<16x4xf32, #tpu.memory_space<vmem>>, %arg2: memref<4x128xf32, #tpu.memory_space<vmem>>, %arg3: memref<1x128xf32, #tpu.memory_space<vmem>>, %arg4: memref<64x256xf32, #tpu.memory_space<vmem>>, %arg5: memref<1x128xf32, #tpu.memory_space<vmem>>, %arg6: memref<2x256xf32, #tpu.memory_space<vmem>>) attributes {dimension_semantics = [#tpu.dimension_semantics<arbitrary>], iteration_bounds = array<i64: 1>, scalar_prefetch = 0 : i64, scratch_operands = 0 : i64, tpu.core_type = #tpu.core_type<tc>, window_params = [{pipeline_mode = #tpu.pipeline_mode<synchronous>, transform_indices = @transform_0, window_bounds = array<i64: 16, 4>}, {pipeline_mode = #tpu.pipeline_mode<synchronous>, transform_indices = @transform_1, window_bounds = array<i64: 4, 128>}, {pipeline_mode = #tpu.pipeline_mode<synchronous>, transform_indices = @transform_2, window_bounds = array<i64: 1, 128>}, {pipeline_mode = #tpu.pipeline_mode<synchronous>, transform_indices = @transform_3, window_bounds = array<i64: 64, 256>}, {pipeline_mode = #tpu.pipeline_mode<synchronous>, transform_indices = @transform_4, window_bounds = array<i64: 1, 128>}, {pipeline_mode = #tpu.pipeline_mode<synchronous>, transform_indices = @transform_5, window_bounds = array<i64: 2, 256>}]} {
    %c0 = arith.constant 0 : index
    %c0_0 = arith.constant 0 : index
    %0 = vector.load %arg1[%c0, %c0_0] : memref<16x4xf32, #tpu.memory_space<vmem>>, vector<16x4xf32>
    %c0_1 = arith.constant 0 : index
    %c0_2 = arith.constant 0 : index
    %1 = vector.load %arg2[%c0_1, %c0_2] : memref<4x128xf32, #tpu.memory_space<vmem>>, vector<4x128xf32>
    %cst = arith.constant dense<0.000000e+00> : vector<16x128xf32>
    %2 = tpu.matmul %0, %1, %cst {dimension_numbers = #tpu.dot_dimension_numbers<[1], [0], [0], [1], [0, 0, 1, 1], [], []>} : vector<16x4xf32>, vector<4x128xf32>, vector<16x128xf32> -> vector<16x128xf32>
    %c0_3 = arith.constant 0 : index
    %c0_4 = arith.constant 0 : index
    %3 = vector.load %arg3[%c0_3, %c0_4] : memref<1x128xf32, #tpu.memory_space<vmem>>, vector<1x128xf32>
    %4 = vector.broadcast %3 : vector<1x128xf32> to vector<16x128xf32>
    %5 = arith.addf %2, %4 : vector<16x128xf32>
    %c0_5 = arith.constant 0 : index
    %c0_6 = arith.constant 0 : index
    %6 = vector.load %arg4[%c0_5, %c0_6] : memref<64x256xf32, #tpu.memory_space<vmem>>, vector<64x256xf32>
    %c0_7 = arith.constant 0 : index
    %c0_8 = arith.constant 0 : index
    %7 = vector.load %arg5[%c0_7, %c0_8] : memref<1x128xf32, #tpu.memory_space<vmem>>, vector<1x128xf32>
    %cst_9 = arith.constant 0.000000e+00 : f32
    %8 = vector.broadcast %cst_9 : f32 to vector<2x32xf32>
    %cst_10 = arith.constant 0.000000e+00 : f32
    %9 = vector.broadcast %cst_10 : f32 to vector<2x32xf32>
    %cst_11 = arith.constant 0.000000e+00 : f32
    %10 = vector.broadcast %cst_11 : f32 to vector<2x32xf32>
    %11 = vector.extract_strided_slice %5 {offsets = [0, 0], sizes = [2, 128], strides = [1, 1]} : vector<16x128xf32> to vector<2x128xf32>
    %12 = arith.negf %11 : vector<2x128xf32>
    %13 = math.exp %12 : vector<2x128xf32>
    %cst_12 = arith.constant 1.000000e+00 : f32
    %14 = vector.broadcast %cst_12 : f32 to vector<2x128xf32>
    %15 = arith.addf %14, %13 : vector<2x128xf32>
    %16 = arith.divf %14, %15 : vector<2x128xf32>
    %17 = vector.extract_strided_slice %16 {offsets = [0, 0], sizes = [2, 32], strides = [1, 1]} : vector<2x128xf32> to vector<2x32xf32>
    %18 = vector.extract_strided_slice %16 {offsets = [0, 32], sizes = [2, 32], strides = [1, 1]} : vector<2x128xf32> to vector<2x32xf32>
    %19 = vector.extract_strided_slice %16 {offsets = [0, 64], sizes = [2, 32], strides = [1, 1]} : vector<2x128xf32> to vector<2x32xf32>
    %cst_13 = arith.constant 2.000000e+00 : f32
    %20 = vector.broadcast %cst_13 : f32 to vector<2x32xf32>
    %21 = arith.mulf %20, %19 : vector<2x32xf32>
    %cst_14 = arith.constant 1.000000e+00 : f32
    %22 = vector.broadcast %cst_14 : f32 to vector<2x32xf32>
    %23 = arith.subf %21, %22 : vector<2x32xf32>
    %24 = vector.extract_strided_slice %16 {offsets = [0, 96], sizes = [2, 32], strides = [1, 1]} : vector<2x128xf32> to vector<2x32xf32>
    %25 = arith.mulf %18, %8 : vector<2x32xf32>
    %26 = arith.mulf %17, %23 : vector<2x32xf32>
    %27 = arith.addf %25, %26 : vector<2x32xf32>
    %28 = math.tanh %27 : vector<2x32xf32>
    %29 = arith.mulf %24, %28 : vector<2x32xf32>
    %30 = tpu.concatenate %29, %9 in 1 : vector<2x32xf32>, vector<2x32xf32> -> vector<2x64xf32>
    %cst_15 = arith.constant dense<0.000000e+00> : vector<2x256xf32>
    %31 = tpu.matmul %30, %6, %cst_15 {dimension_numbers = #tpu.dot_dimension_numbers<[1], [0], [0], [1], [0, 0, 1, 1], [], []>} : vector<2x64xf32>, vector<64x256xf32>, vector<2x256xf32> -> vector<2x256xf32>
    %32 = vector.extract_strided_slice %5 {offsets = [2, 0], sizes = [2, 128], strides = [1, 1]} : vector<16x128xf32> to vector<2x128xf32>
    %33 = vector.extract_strided_slice %31 {offsets = [0, 0], sizes = [2, 128], strides = [1, 1]} : vector<2x256xf32> to vector<2x128xf32>
    %34 = arith.addf %32, %33 : vector<2x128xf32>
    %35 = arith.negf %34 : vector<2x128xf32>
    %36 = math.exp %35 : vector<2x128xf32>
    %cst_16 = arith.constant 1.000000e+00 : f32
    %37 = vector.broadcast %cst_16 : f32 to vector<2x128xf32>
    %38 = arith.addf %37, %36 : vector<2x128xf32>
    %39 = arith.divf %37, %38 : vector<2x128xf32>
    %40 = vector.extract_strided_slice %39 {offsets = [0, 0], sizes = [2, 32], strides = [1, 1]} : vector<2x128xf32> to vector<2x32xf32>
    %41 = vector.extract_strided_slice %39 {offsets = [0, 32], sizes = [2, 32], strides = [1, 1]} : vector<2x128xf32> to vector<2x32xf32>
    %42 = vector.extract_strided_slice %39 {offsets = [0, 64], sizes = [2, 32], strides = [1, 1]} : vector<2x128xf32> to vector<2x32xf32>
    %cst_17 = arith.constant 2.000000e+00 : f32
    %43 = vector.broadcast %cst_17 : f32 to vector<2x32xf32>
    %44 = arith.mulf %43, %42 : vector<2x32xf32>
    %cst_18 = arith.constant 1.000000e+00 : f32
    %45 = vector.broadcast %cst_18 : f32 to vector<2x32xf32>
    %46 = arith.subf %44, %45 : vector<2x32xf32>
    %47 = vector.extract_strided_slice %39 {offsets = [0, 96], sizes = [2, 32], strides = [1, 1]} : vector<2x128xf32> to vector<2x32xf32>
    %48 = arith.mulf %41, %27 : vector<2x32xf32>
    %49 = arith.mulf %40, %46 : vector<2x32xf32>
    %50 = arith.addf %48, %49 : vector<2x32xf32>
    %51 = math.tanh %50 : vector<2x32xf32>
    %52 = arith.mulf %47, %51 : vector<2x32xf32>
    %53 = vector.extract_strided_slice %31 {offsets = [0, 128], sizes = [2, 128], strides = [1, 1]} : vector<2x256xf32> to vector<2x128xf32>
    %54 = vector.broadcast %7 : vector<1x128xf32> to vector<2x128xf32>
    %55 = arith.addf %53, %54 : vector<2x128xf32>
    %56 = arith.negf %55 : vector<2x128xf32>
    %57 = math.exp %56 : vector<2x128xf32>
    %cst_19 = arith.constant 1.000000e+00 : f32
    %58 = vector.broadcast %cst_19 : f32 to vector<2x128xf32>
    %59 = arith.addf %58, %57 : vector<2x128xf32>
    %60 = arith.divf %58, %59 : vector<2x128xf32>
    %61 = vector.extract_strided_slice %60 {offsets = [0, 0], sizes = [2, 32], strides = [1, 1]} : vector<2x128xf32> to vector<2x32xf32>
    %62 = vector.extract_strided_slice %60 {offsets = [0, 32], sizes = [2, 32], strides = [1, 1]} : vector<2x128xf32> to vector<2x32xf32>
    %63 = vector.extract_strided_slice %60 {offsets = [0, 64], sizes = [2, 32], strides = [1, 1]} : vector<2x128xf32> to vector<2x32xf32>
    %cst_20 = arith.constant 2.000000e+00 : f32
    %64 = vector.broadcast %cst_20 : f32 to vector<2x32xf32>
    %65 = arith.mulf %64, %63 : vector<2x32xf32>
    %cst_21 = arith.constant 1.000000e+00 : f32
    %66 = vector.broadcast %cst_21 : f32 to vector<2x32xf32>
    %67 = arith.subf %65, %66 : vector<2x32xf32>
    %68 = vector.extract_strided_slice %60 {offsets = [0, 96], sizes = [2, 32], strides = [1, 1]} : vector<2x128xf32> to vector<2x32xf32>
    %69 = arith.mulf %62, %10 : vector<2x32xf32>
    %70 = arith.mulf %61, %67 : vector<2x32xf32>
    %71 = arith.addf %69, %70 : vector<2x32xf32>
    %72 = math.tanh %71 : vector<2x32xf32>
    %73 = arith.mulf %68, %72 : vector<2x32xf32>
    %c0_22 = arith.constant 0 : index
    %c0_23 = arith.constant 0 : index
    %74 = vector.load %arg6[%c0_22, %c0_23] : memref<2x256xf32, #tpu.memory_space<vmem>>, vector<2x32xf32>
    tpu.vector_store %arg6[%c0_22, %c0_23], %73 {strides = array<i32>} : memref<2x256xf32, #tpu.memory_space<vmem>>, vector<2x32xf32>,
    %75 = tpu.concatenate %52, %73 in 1 : vector<2x32xf32>, vector<2x32xf32> -> vector<2x64xf32>
    %cst_24 = arith.constant dense<0.000000e+00> : vector<2x256xf32>
    %76 = tpu.matmul %75, %6, %cst_24 {dimension_numbers = #tpu.dot_dimension_numbers<[1], [0], [0], [1], [0, 0, 1, 1], [], []>} : vector<2x64xf32>, vector<64x256xf32>, vector<2x256xf32> -> vector<2x256xf32>
    %77 = vector.extract_strided_slice %5 {offsets = [4, 0], sizes = [2, 128], strides = [1, 1]} : vector<16x128xf32> to vector<2x128xf32>
    %78 = vector.extract_strided_slice %76 {offsets = [0, 0], sizes = [2, 128], strides = [1, 1]} : vector<2x256xf32> to vector<2x128xf32>
    %79 = arith.addf %77, %78 : vector<2x128xf32>
    %80 = arith.negf %79 : vector<2x128xf32>
    %81 = math.exp %80 : vector<2x128xf32>
    %cst_25 = arith.constant 1.000000e+00 : f32
    %82 = vector.broadcast %cst_25 : f32 to vector<2x128xf32>
    %83 = arith.addf %82, %81 : vector<2x128xf32>
    %84 = arith.divf %82, %83 : vector<2x128xf32>
    %85 = vector.extract_strided_slice %84 {offsets = [0, 0], sizes = [2, 32], strides = [1, 1]} : vector<2x128xf32> to vector<2x32xf32>
    %86 = vector.extract_strided_slice %84 {offsets = [0, 32], sizes = [2, 32], strides = [1, 1]} : vector<2x128xf32> to vector<2x32xf32>
    %87 = vector.extract_strided_slice %84 {offsets = [0, 64], sizes = [2, 32], strides = [1, 1]} : vector<2x128xf32> to vector<2x32xf32>
    %cst_26 = arith.constant 2.000000e+00 : f32
    %88 = vector.broadcast %cst_26 : f32 to vector<2x32xf32>
    %89 = arith.mulf %88, %87 : vector<2x32xf32>
    %cst_27 = arith.constant 1.000000e+00 : f32
    %90 = vector.broadcast %cst_27 : f32 to vector<2x32xf32>
    %91 = arith.subf %89, %90 : vector<2x32xf32>
    %92 = vector.extract_strided_slice %84 {offsets = [0, 96], sizes = [2, 32], strides = [1, 1]} : vector<2x128xf32> to vector<2x32xf32>
    %93 = arith.mulf %86, %50 : vector<2x32xf32>
    %94 = arith.mulf %85, %91 : vector<2x32xf32>
    %95 = arith.addf %93, %94 : vector<2x32xf32>
    %96 = math.tanh %95 : vector<2x32xf32>
    %97 = arith.mulf %92, %96 : vector<2x32xf32>
    %98 = vector.extract_strided_slice %76 {offsets = [0, 128], sizes = [2, 128], strides = [1, 1]} : vector<2x256xf32> to vector<2x128xf32>
    %99 = vector.broadcast %7 : vector<1x128xf32> to vector<2x128xf32>
    %100 = arith.addf %98, %99 : vector<2x128xf32>
    %101 = arith.negf %100 : vector<2x128xf32>
    %102 = math.exp %101 : vector<2x128xf32>
    %cst_28 = arith.constant 1.000000e+00 : f32
    %103 = vector.broadcast %cst_28 : f32 to vector<2x128xf32>
    %104 = arith.addf %103, %102 : vector<2x128xf32>
    %105 = arith.divf %103, %104 : vector<2x128xf32>
    %106 = vector.extract_strided_slice %105 {offsets = [0, 0], sizes = [2, 32], strides = [1, 1]} : vector<2x128xf32> to vector<2x32xf32>
    %107 = vector.extract_strided_slice %105 {offsets = [0, 32], sizes = [2, 32], strides = [1, 1]} : vector<2x128xf32> to vector<2x32xf32>
    %108 = vector.extract_strided_slice %105 {offsets = [0, 64], sizes = [2, 32], strides = [1, 1]} : vector<2x128xf32> to vector<2x32xf32>
    %cst_29 = arith.constant 2.000000e+00 : f32
    %109 = vector.broadcast %cst_29 : f32 to vector<2x32xf32>
    %110 = arith.mulf %109, %108 : vector<2x32xf32>
    %cst_30 = arith.constant 1.000000e+00 : f32
    %111 = vector.broadcast %cst_30 : f32 to vector<2x32xf32>
    %112 = arith.subf %110, %111 : vector<2x32xf32>
    %113 = vector.extract_strided_slice %105 {offsets = [0, 96], sizes = [2, 32], strides = [1, 1]} : vector<2x128xf32> to vector<2x32xf32>
    %114 = arith.mulf %107, %71 : vector<2x32xf32>
    %115 = arith.mulf %106, %112 : vector<2x32xf32>
    %116 = arith.addf %114, %115 : vector<2x32xf32>
    %117 = math.tanh %116 : vector<2x32xf32>
    %118 = arith.mulf %113, %117 : vector<2x32xf32>
    %c0_31 = arith.constant 0 : index
    %c32 = arith.constant 32 : index
    %119 = vector.load %arg6[%c0_31, %c32] : memref<2x256xf32, #tpu.memory_space<vmem>>, vector<2x32xf32>
    tpu.vector_store %arg6[%c0_31, %c32], %118 {strides = array<i32>} : memref<2x256xf32, #tpu.memory_space<vmem>>, vector<2x32xf32>,
    %120 = tpu.concatenate %97, %118 in 1 : vector<2x32xf32>, vector<2x32xf32> -> vector<2x64xf32>
    %cst_32 = arith.constant dense<0.000000e+00> : vector<2x256xf32>
    %121 = tpu.matmul %120, %6, %cst_32 {dimension_numbers = #tpu.dot_dimension_numbers<[1], [0], [0], [1], [0, 0, 1, 1], [], []>} : vector<2x64xf32>, vector<64x256xf32>, vector<2x256xf32> -> vector<2x256xf32>
    %122 = vector.extract_strided_slice %5 {offsets = [6, 0], sizes = [2, 128], strides = [1, 1]} : vector<16x128xf32> to vector<2x128xf32>
    %123 = vector.extract_strided_slice %121 {offsets = [0, 0], sizes = [2, 128], strides = [1, 1]} : vector<2x256xf32> to vector<2x128xf32>
    %124 = arith.addf %122, %123 : vector<2x128xf32>
    %125 = arith.negf %124 : vector<2x128xf32>
    %126 = math.exp %125 : vector<2x128xf32>
    %cst_33 = arith.constant 1.000000e+00 : f32
    %127 = vector.broadcast %cst_33 : f32 to vector<2x128xf32>
    %128 = arith.addf %127, %126 : vector<2x128xf32>
    %129 = arith.divf %127, %128 : vector<2x128xf32>
    %130 = vector.extract_strided_slice %129 {offsets = [0, 0], sizes = [2, 32], strides = [1, 1]} : vector<2x128xf32> to vector<2x32xf32>
    %131 = vector.extract_strided_slice %129 {offsets = [0, 32], sizes = [2, 32], strides = [1, 1]} : vector<2x128xf32> to vector<2x32xf32>
    %132 = vector.extract_strided_slice %129 {offsets = [0, 64], sizes = [2, 32], strides = [1, 1]} : vector<2x128xf32> to vector<2x32xf32>
    %cst_34 = arith.constant 2.000000e+00 : f32
    %133 = vector.broadcast %cst_34 : f32 to vector<2x32xf32>
    %134 = arith.mulf %133, %132 : vector<2x32xf32>
    %cst_35 = arith.constant 1.000000e+00 : f32
    %135 = vector.broadcast %cst_35 : f32 to vector<2x32xf32>
    %136 = arith.subf %134, %135 : vector<2x32xf32>
    %137 = vector.extract_strided_slice %129 {offsets = [0, 96], sizes = [2, 32], strides = [1, 1]} : vector<2x128xf32> to vector<2x32xf32>
    %138 = arith.mulf %131, %95 : vector<2x32xf32>
    %139 = arith.mulf %130, %136 : vector<2x32xf32>
    %140 = arith.addf %138, %139 : vector<2x32xf32>
    %141 = math.tanh %140 : vector<2x32xf32>
    %142 = arith.mulf %137, %141 : vector<2x32xf32>
    %143 = vector.extract_strided_slice %121 {offsets = [0, 128], sizes = [2, 128], strides = [1, 1]} : vector<2x256xf32> to vector<2x128xf32>
    %144 = vector.broadcast %7 : vector<1x128xf32> to vector<2x128xf32>
    %145 = arith.addf %143, %144 : vector<2x128xf32>
    %146 = arith.negf %145 : vector<2x128xf32>
    %147 = math.exp %146 : vector<2x128xf32>
    %cst_36 = arith.constant 1.000000e+00 : f32
    %148 = vector.broadcast %cst_36 : f32 to vector<2x128xf32>
    %149 = arith.addf %148, %147 : vector<2x128xf32>
    %150 = arith.divf %148, %149 : vector<2x128xf32>
    %151 = vector.extract_strided_slice %150 {offsets = [0, 0], sizes = [2, 32], strides = [1, 1]} : vector<2x128xf32> to vector<2x32xf32>
    %152 = vector.extract_strided_slice %150 {offsets = [0, 32], sizes = [2, 32], strides = [1, 1]} : vector<2x128xf32> to vector<2x32xf32>
    %153 = vector.extract_strided_slice %150 {offsets = [0, 64], sizes = [2, 32], strides = [1, 1]} : vector<2x128xf32> to vector<2x32xf32>
    %cst_37 = arith.constant 2.000000e+00 : f32
    %154 = vector.broadcast %cst_37 : f32 to vector<2x32xf32>
    %155 = arith.mulf %154, %153 : vector<2x32xf32>
    %cst_38 = arith.constant 1.000000e+00 : f32
    %156 = vector.broadcast %cst_38 : f32 to vector<2x32xf32>
    %157 = arith.subf %155, %156 : vector<2x32xf32>
    %158 = vector.extract_strided_slice %150 {offsets = [0, 96], sizes = [2, 32], strides = [1, 1]} : vector<2x128xf32> to vector<2x32xf32>
    %159 = arith.mulf %152, %116 : vector<2x32xf32>
    %160 = arith.mulf %151, %157 : vector<2x32xf32>
    %161 = arith.addf %159, %160 : vector<2x32xf32>
    %162 = math.tanh %161 : vector<2x32xf32>
    %163 = arith.mulf %158, %162 : vector<2x32xf32>
    %c0_39 = arith.constant 0 : index
    %c64 = arith.constant 64 : index
    %164 = vector.load %arg6[%c0_39, %c64] : memref<2x256xf32, #tpu.memory_space<vmem>>, vector<2x32xf32>
    tpu.vector_store %arg6[%c0_39, %c64], %163 {strides = array<i32>} : memref<2x256xf32, #tpu.memory_space<vmem>>, vector<2x32xf32>,
    %165 = tpu.concatenate %142, %163 in 1 : vector<2x32xf32>, vector<2x32xf32> -> vector<2x64xf32>
    %cst_40 = arith.constant dense<0.000000e+00> : vector<2x256xf32>
    %166 = tpu.matmul %165, %6, %cst_40 {dimension_numbers = #tpu.dot_dimension_numbers<[1], [0], [0], [1], [0, 0, 1, 1], [], []>} : vector<2x64xf32>, vector<64x256xf32>, vector<2x256xf32> -> vector<2x256xf32>
    %167 = vector.extract_strided_slice %5 {offsets = [8, 0], sizes = [2, 128], strides = [1, 1]} : vector<16x128xf32> to vector<2x128xf32>
    %168 = vector.extract_strided_slice %166 {offsets = [0, 0], sizes = [2, 128], strides = [1, 1]} : vector<2x256xf32> to vector<2x128xf32>
    %169 = arith.addf %167, %168 : vector<2x128xf32>
    %170 = arith.negf %169 : vector<2x128xf32>
    %171 = math.exp %170 : vector<2x128xf32>
    %cst_41 = arith.constant 1.000000e+00 : f32
    %172 = vector.broadcast %cst_41 : f32 to vector<2x128xf32>
    %173 = arith.addf %172, %171 : vector<2x128xf32>
    %174 = arith.divf %172, %173 : vector<2x128xf32>
    %175 = vector.extract_strided_slice %174 {offsets = [0, 0], sizes = [2, 32], strides = [1, 1]} : vector<2x128xf32> to vector<2x32xf32>
    %176 = vector.extract_strided_slice %174 {offsets = [0, 32], sizes = [2, 32], strides = [1, 1]} : vector<2x128xf32> to vector<2x32xf32>
    %177 = vector.extract_strided_slice %174 {offsets = [0, 64], sizes = [2, 32], strides = [1, 1]} : vector<2x128xf32> to vector<2x32xf32>
    %cst_42 = arith.constant 2.000000e+00 : f32
    %178 = vector.broadcast %cst_42 : f32 to vector<2x32xf32>
    %179 = arith.mulf %178, %177 : vector<2x32xf32>
    %cst_43 = arith.constant 1.000000e+00 : f32
    %180 = vector.broadcast %cst_43 : f32 to vector<2x32xf32>
    %181 = arith.subf %179, %180 : vector<2x32xf32>
    %182 = vector.extract_strided_slice %174 {offsets = [0, 96], sizes = [2, 32], strides = [1, 1]} : vector<2x128xf32> to vector<2x32xf32>
    %183 = arith.mulf %176, %140 : vector<2x32xf32>
    %184 = arith.mulf %175, %181 : vector<2x32xf32>
    %185 = arith.addf %183, %184 : vector<2x32xf32>
    %186 = math.tanh %185 : vector<2x32xf32>
    %187 = arith.mulf %182, %186 : vector<2x32xf32>
    %188 = vector.extract_strided_slice %166 {offsets = [0, 128], sizes = [2, 128], strides = [1, 1]} : vector<2x256xf32> to vector<2x128xf32>
    %189 = vector.broadcast %7 : vector<1x128xf32> to vector<2x128xf32>
    %190 = arith.addf %188, %189 : vector<2x128xf32>
    %191 = arith.negf %190 : vector<2x128xf32>
    %192 = math.exp %191 : vector<2x128xf32>
    %cst_44 = arith.constant 1.000000e+00 : f32
    %193 = vector.broadcast %cst_44 : f32 to vector<2x128xf32>
    %194 = arith.addf %193, %192 : vector<2x128xf32>
    %195 = arith.divf %193, %194 : vector<2x128xf32>
    %196 = vector.extract_strided_slice %195 {offsets = [0, 0], sizes = [2, 32], strides = [1, 1]} : vector<2x128xf32> to vector<2x32xf32>
    %197 = vector.extract_strided_slice %195 {offsets = [0, 32], sizes = [2, 32], strides = [1, 1]} : vector<2x128xf32> to vector<2x32xf32>
    %198 = vector.extract_strided_slice %195 {offsets = [0, 64], sizes = [2, 32], strides = [1, 1]} : vector<2x128xf32> to vector<2x32xf32>
    %cst_45 = arith.constant 2.000000e+00 : f32
    %199 = vector.broadcast %cst_45 : f32 to vector<2x32xf32>
    %200 = arith.mulf %199, %198 : vector<2x32xf32>
    %cst_46 = arith.constant 1.000000e+00 : f32
    %201 = vector.broadcast %cst_46 : f32 to vector<2x32xf32>
    %202 = arith.subf %200, %201 : vector<2x32xf32>
    %203 = vector.extract_strided_slice %195 {offsets = [0, 96], sizes = [2, 32], strides = [1, 1]} : vector<2x128xf32> to vector<2x32xf32>
    %204 = arith.mulf %197, %161 : vector<2x32xf32>
    %205 = arith.mulf %196, %202 : vector<2x32xf32>
    %206 = arith.addf %204, %205 : vector<2x32xf32>
    %207 = math.tanh %206 : vector<2x32xf32>
    %208 = arith.mulf %203, %207 : vector<2x32xf32>
    %c0_47 = arith.constant 0 : index
    %c96 = arith.constant 96 : index
    %209 = vector.load %arg6[%c0_47, %c96] : memref<2x256xf32, #tpu.memory_space<vmem>>, vector<2x32xf32>
    tpu.vector_store %arg6[%c0_47, %c96], %208 {strides = array<i32>} : memref<2x256xf32, #tpu.memory_space<vmem>>, vector<2x32xf32>,
    %210 = tpu.concatenate %187, %208 in 1 : vector<2x32xf32>, vector<2x32xf32> -> vector<2x64xf32>
    %cst_48 = arith.constant dense<0.000000e+00> : vector<2x256xf32>
    %211 = tpu.matmul %210, %6, %cst_48 {dimension_numbers = #tpu.dot_dimension_numbers<[1], [0], [0], [1], [0, 0, 1, 1], [], []>} : vector<2x64xf32>, vector<64x256xf32>, vector<2x256xf32> -> vector<2x256xf32>
    %212 = vector.extract_strided_slice %5 {offsets = [10, 0], sizes = [2, 128], strides = [1, 1]} : vector<16x128xf32> to vector<2x128xf32>
    %213 = vector.extract_strided_slice %211 {offsets = [0, 0], sizes = [2, 128], strides = [1, 1]} : vector<2x256xf32> to vector<2x128xf32>
    %214 = arith.addf %212, %213 : vector<2x128xf32>
    %215 = arith.negf %214 : vector<2x128xf32>
    %216 = math.exp %215 : vector<2x128xf32>
    %cst_49 = arith.constant 1.000000e+00 : f32
    %217 = vector.broadcast %cst_49 : f32 to vector<2x128xf32>
    %218 = arith.addf %217, %216 : vector<2x128xf32>
    %219 = arith.divf %217, %218 : vector<2x128xf32>
    %220 = vector.extract_strided_slice %219 {offsets = [0, 0], sizes = [2, 32], strides = [1, 1]} : vector<2x128xf32> to vector<2x32xf32>
    %221 = vector.extract_strided_slice %219 {offsets = [0, 32], sizes = [2, 32], strides = [1, 1]} : vector<2x128xf32> to vector<2x32xf32>
    %222 = vector.extract_strided_slice %219 {offsets = [0, 64], sizes = [2, 32], strides = [1, 1]} : vector<2x128xf32> to vector<2x32xf32>
    %cst_50 = arith.constant 2.000000e+00 : f32
    %223 = vector.broadcast %cst_50 : f32 to vector<2x32xf32>
    %224 = arith.mulf %223, %222 : vector<2x32xf32>
    %cst_51 = arith.constant 1.000000e+00 : f32
    %225 = vector.broadcast %cst_51 : f32 to vector<2x32xf32>
    %226 = arith.subf %224, %225 : vector<2x32xf32>
    %227 = vector.extract_strided_slice %219 {offsets = [0, 96], sizes = [2, 32], strides = [1, 1]} : vector<2x128xf32> to vector<2x32xf32>
    %228 = arith.mulf %221, %185 : vector<2x32xf32>
    %229 = arith.mulf %220, %226 : vector<2x32xf32>
    %230 = arith.addf %228, %229 : vector<2x32xf32>
    %231 = math.tanh %230 : vector<2x32xf32>
    %232 = arith.mulf %227, %231 : vector<2x32xf32>
    %233 = vector.extract_strided_slice %211 {offsets = [0, 128], sizes = [2, 128], strides = [1, 1]} : vector<2x256xf32> to vector<2x128xf32>
    %234 = vector.broadcast %7 : vector<1x128xf32> to vector<2x128xf32>
    %235 = arith.addf %233, %234 : vector<2x128xf32>
    %236 = arith.negf %235 : vector<2x128xf32>
    %237 = math.exp %236 : vector<2x128xf32>
    %cst_52 = arith.constant 1.000000e+00 : f32
    %238 = vector.broadcast %cst_52 : f32 to vector<2x128xf32>
    %239 = arith.addf %238, %237 : vector<2x128xf32>
    %240 = arith.divf %238, %239 : vector<2x128xf32>
    %241 = vector.extract_strided_slice %240 {offsets = [0, 0], sizes = [2, 32], strides = [1, 1]} : vector<2x128xf32> to vector<2x32xf32>
    %242 = vector.extract_strided_slice %240 {offsets = [0, 32], sizes = [2, 32], strides = [1, 1]} : vector<2x128xf32> to vector<2x32xf32>
    %243 = vector.extract_strided_slice %240 {offsets = [0, 64], sizes = [2, 32], strides = [1, 1]} : vector<2x128xf32> to vector<2x32xf32>
    %cst_53 = arith.constant 2.000000e+00 : f32
    %244 = vector.broadcast %cst_53 : f32 to vector<2x32xf32>
    %245 = arith.mulf %244, %243 : vector<2x32xf32>
    %cst_54 = arith.constant 1.000000e+00 : f32
    %246 = vector.broadcast %cst_54 : f32 to vector<2x32xf32>
    %247 = arith.subf %245, %246 : vector<2x32xf32>
    %248 = vector.extract_strided_slice %240 {offsets = [0, 96], sizes = [2, 32], strides = [1, 1]} : vector<2x128xf32> to vector<2x32xf32>
    %249 = arith.mulf %242, %206 : vector<2x32xf32>
    %250 = arith.mulf %241, %247 : vector<2x32xf32>
    %251 = arith.addf %249, %250 : vector<2x32xf32>
    %252 = math.tanh %251 : vector<2x32xf32>
    %253 = arith.mulf %248, %252 : vector<2x32xf32>
    %c0_55 = arith.constant 0 : index
    %c128 = arith.constant 128 : index
    %254 = vector.load %arg6[%c0_55, %c128] : memref<2x256xf32, #tpu.memory_space<vmem>>, vector<2x32xf32>
    tpu.vector_store %arg6[%c0_55, %c128], %253 {strides = array<i32>} : memref<2x256xf32, #tpu.memory_space<vmem>>, vector<2x32xf32>,
    %255 = tpu.concatenate %232, %253 in 1 : vector<2x32xf32>, vector<2x32xf32> -> vector<2x64xf32>
    %cst_56 = arith.constant dense<0.000000e+00> : vector<2x256xf32>
    %256 = tpu.matmul %255, %6, %cst_56 {dimension_numbers = #tpu.dot_dimension_numbers<[1], [0], [0], [1], [0, 0, 1, 1], [], []>} : vector<2x64xf32>, vector<64x256xf32>, vector<2x256xf32> -> vector<2x256xf32>
    %257 = vector.extract_strided_slice %5 {offsets = [12, 0], sizes = [2, 128], strides = [1, 1]} : vector<16x128xf32> to vector<2x128xf32>
    %258 = vector.extract_strided_slice %256 {offsets = [0, 0], sizes = [2, 128], strides = [1, 1]} : vector<2x256xf32> to vector<2x128xf32>
    %259 = arith.addf %257, %258 : vector<2x128xf32>
    %260 = arith.negf %259 : vector<2x128xf32>
    %261 = math.exp %260 : vector<2x128xf32>
    %cst_57 = arith.constant 1.000000e+00 : f32
    %262 = vector.broadcast %cst_57 : f32 to vector<2x128xf32>
    %263 = arith.addf %262, %261 : vector<2x128xf32>
    %264 = arith.divf %262, %263 : vector<2x128xf32>
    %265 = vector.extract_strided_slice %264 {offsets = [0, 0], sizes = [2, 32], strides = [1, 1]} : vector<2x128xf32> to vector<2x32xf32>
    %266 = vector.extract_strided_slice %264 {offsets = [0, 32], sizes = [2, 32], strides = [1, 1]} : vector<2x128xf32> to vector<2x32xf32>
    %267 = vector.extract_strided_slice %264 {offsets = [0, 64], sizes = [2, 32], strides = [1, 1]} : vector<2x128xf32> to vector<2x32xf32>
    %cst_58 = arith.constant 2.000000e+00 : f32
    %268 = vector.broadcast %cst_58 : f32 to vector<2x32xf32>
    %269 = arith.mulf %268, %267 : vector<2x32xf32>
    %cst_59 = arith.constant 1.000000e+00 : f32
    %270 = vector.broadcast %cst_59 : f32 to vector<2x32xf32>
    %271 = arith.subf %269, %270 : vector<2x32xf32>
    %272 = vector.extract_strided_slice %264 {offsets = [0, 96], sizes = [2, 32], strides = [1, 1]} : vector<2x128xf32> to vector<2x32xf32>
    %273 = arith.mulf %266, %230 : vector<2x32xf32>
    %274 = arith.mulf %265, %271 : vector<2x32xf32>
    %275 = arith.addf %273, %274 : vector<2x32xf32>
    %276 = math.tanh %275 : vector<2x32xf32>
    %277 = arith.mulf %272, %276 : vector<2x32xf32>
    %278 = vector.extract_strided_slice %256 {offsets = [0, 128], sizes = [2, 128], strides = [1, 1]} : vector<2x256xf32> to vector<2x128xf32>
    %279 = vector.broadcast %7 : vector<1x128xf32> to vector<2x128xf32>
    %280 = arith.addf %278, %279 : vector<2x128xf32>
    %281 = arith.negf %280 : vector<2x128xf32>
    %282 = math.exp %281 : vector<2x128xf32>
    %cst_60 = arith.constant 1.000000e+00 : f32
    %283 = vector.broadcast %cst_60 : f32 to vector<2x128xf32>
    %284 = arith.addf %283, %282 : vector<2x128xf32>
    %285 = arith.divf %283, %284 : vector<2x128xf32>
    %286 = vector.extract_strided_slice %285 {offsets = [0, 0], sizes = [2, 32], strides = [1, 1]} : vector<2x128xf32> to vector<2x32xf32>
    %287 = vector.extract_strided_slice %285 {offsets = [0, 32], sizes = [2, 32], strides = [1, 1]} : vector<2x128xf32> to vector<2x32xf32>
    %288 = vector.extract_strided_slice %285 {offsets = [0, 64], sizes = [2, 32], strides = [1, 1]} : vector<2x128xf32> to vector<2x32xf32>
    %cst_61 = arith.constant 2.000000e+00 : f32
    %289 = vector.broadcast %cst_61 : f32 to vector<2x32xf32>
    %290 = arith.mulf %289, %288 : vector<2x32xf32>
    %cst_62 = arith.constant 1.000000e+00 : f32
    %291 = vector.broadcast %cst_62 : f32 to vector<2x32xf32>
    %292 = arith.subf %290, %291 : vector<2x32xf32>
    %293 = vector.extract_strided_slice %285 {offsets = [0, 96], sizes = [2, 32], strides = [1, 1]} : vector<2x128xf32> to vector<2x32xf32>
    %294 = arith.mulf %287, %251 : vector<2x32xf32>
    %295 = arith.mulf %286, %292 : vector<2x32xf32>
    %296 = arith.addf %294, %295 : vector<2x32xf32>
    %297 = math.tanh %296 : vector<2x32xf32>
    %298 = arith.mulf %293, %297 : vector<2x32xf32>
    %c0_63 = arith.constant 0 : index
    %c160 = arith.constant 160 : index
    %299 = vector.load %arg6[%c0_63, %c160] : memref<2x256xf32, #tpu.memory_space<vmem>>, vector<2x32xf32>
    tpu.vector_store %arg6[%c0_63, %c160], %298 {strides = array<i32>} : memref<2x256xf32, #tpu.memory_space<vmem>>, vector<2x32xf32>,
    %300 = tpu.concatenate %277, %298 in 1 : vector<2x32xf32>, vector<2x32xf32> -> vector<2x64xf32>
    %cst_64 = arith.constant dense<0.000000e+00> : vector<2x256xf32>
    %301 = tpu.matmul %300, %6, %cst_64 {dimension_numbers = #tpu.dot_dimension_numbers<[1], [0], [0], [1], [0, 0, 1, 1], [], []>} : vector<2x64xf32>, vector<64x256xf32>, vector<2x256xf32> -> vector<2x256xf32>
    %302 = vector.extract_strided_slice %5 {offsets = [14, 0], sizes = [2, 128], strides = [1, 1]} : vector<16x128xf32> to vector<2x128xf32>
    %303 = vector.extract_strided_slice %301 {offsets = [0, 0], sizes = [2, 128], strides = [1, 1]} : vector<2x256xf32> to vector<2x128xf32>
    %304 = arith.addf %302, %303 : vector<2x128xf32>
    %305 = arith.negf %304 : vector<2x128xf32>
    %306 = math.exp %305 : vector<2x128xf32>
    %cst_65 = arith.constant 1.000000e+00 : f32
    %307 = vector.broadcast %cst_65 : f32 to vector<2x128xf32>
    %308 = arith.addf %307, %306 : vector<2x128xf32>
    %309 = arith.divf %307, %308 : vector<2x128xf32>
    %310 = vector.extract_strided_slice %309 {offsets = [0, 0], sizes = [2, 32], strides = [1, 1]} : vector<2x128xf32> to vector<2x32xf32>
    %311 = vector.extract_strided_slice %309 {offsets = [0, 32], sizes = [2, 32], strides = [1, 1]} : vector<2x128xf32> to vector<2x32xf32>
    %312 = vector.extract_strided_slice %309 {offsets = [0, 64], sizes = [2, 32], strides = [1, 1]} : vector<2x128xf32> to vector<2x32xf32>
    %cst_66 = arith.constant 2.000000e+00 : f32
    %313 = vector.broadcast %cst_66 : f32 to vector<2x32xf32>
    %314 = arith.mulf %313, %312 : vector<2x32xf32>
    %cst_67 = arith.constant 1.000000e+00 : f32
    %315 = vector.broadcast %cst_67 : f32 to vector<2x32xf32>
    %316 = arith.subf %314, %315 : vector<2x32xf32>
    %317 = vector.extract_strided_slice %309 {offsets = [0, 96], sizes = [2, 32], strides = [1, 1]} : vector<2x128xf32> to vector<2x32xf32>
    %318 = arith.mulf %311, %275 : vector<2x32xf32>
    %319 = arith.mulf %310, %316 : vector<2x32xf32>
    %320 = arith.addf %318, %319 : vector<2x32xf32>
    %321 = math.tanh %320 : vector<2x32xf32>
    %322 = arith.mulf %317, %321 : vector<2x32xf32>
    %323 = vector.extract_strided_slice %301 {offsets = [0, 128], sizes = [2, 128], strides = [1, 1]} : vector<2x256xf32> to vector<2x128xf32>
    %324 = vector.broadcast %7 : vector<1x128xf32> to vector<2x128xf32>
    %325 = arith.addf %323, %324 : vector<2x128xf32>
    %326 = arith.negf %325 : vector<2x128xf32>
    %327 = math.exp %326 : vector<2x128xf32>
    %cst_68 = arith.constant 1.000000e+00 : f32
    %328 = vector.broadcast %cst_68 : f32 to vector<2x128xf32>
    %329 = arith.addf %328, %327 : vector<2x128xf32>
    %330 = arith.divf %328, %329 : vector<2x128xf32>
    %331 = vector.extract_strided_slice %330 {offsets = [0, 0], sizes = [2, 32], strides = [1, 1]} : vector<2x128xf32> to vector<2x32xf32>
    %332 = vector.extract_strided_slice %330 {offsets = [0, 32], sizes = [2, 32], strides = [1, 1]} : vector<2x128xf32> to vector<2x32xf32>
    %333 = vector.extract_strided_slice %330 {offsets = [0, 64], sizes = [2, 32], strides = [1, 1]} : vector<2x128xf32> to vector<2x32xf32>
    %cst_69 = arith.constant 2.000000e+00 : f32
    %334 = vector.broadcast %cst_69 : f32 to vector<2x32xf32>
    %335 = arith.mulf %334, %333 : vector<2x32xf32>
    %cst_70 = arith.constant 1.000000e+00 : f32
    %336 = vector.broadcast %cst_70 : f32 to vector<2x32xf32>
    %337 = arith.subf %335, %336 : vector<2x32xf32>
    %338 = vector.extract_strided_slice %330 {offsets = [0, 96], sizes = [2, 32], strides = [1, 1]} : vector<2x128xf32> to vector<2x32xf32>
    %339 = arith.mulf %332, %296 : vector<2x32xf32>
    %340 = arith.mulf %331, %337 : vector<2x32xf32>
    %341 = arith.addf %339, %340 : vector<2x32xf32>
    %342 = math.tanh %341 : vector<2x32xf32>
    %343 = arith.mulf %338, %342 : vector<2x32xf32>
    %c0_71 = arith.constant 0 : index
    %c192 = arith.constant 192 : index
    %344 = vector.load %arg6[%c0_71, %c192] : memref<2x256xf32, #tpu.memory_space<vmem>>, vector<2x32xf32>
    tpu.vector_store %arg6[%c0_71, %c192], %343 {strides = array<i32>} : memref<2x256xf32, #tpu.memory_space<vmem>>, vector<2x32xf32>,
    %345 = tpu.concatenate %322, %343 in 1 : vector<2x32xf32>, vector<2x32xf32> -> vector<2x64xf32>
    %cst_72 = arith.constant dense<0.000000e+00> : vector<2x256xf32>
    %346 = tpu.matmul %345, %6, %cst_72 {dimension_numbers = #tpu.dot_dimension_numbers<[1], [0], [0], [1], [0, 0, 1, 1], [], []>} : vector<2x64xf32>, vector<64x256xf32>, vector<2x256xf32> -> vector<2x256xf32>
    %347 = vector.extract_strided_slice %346 {offsets = [0, 128], sizes = [2, 128], strides = [1, 1]} : vector<2x256xf32> to vector<2x128xf32>
    %348 = vector.broadcast %7 : vector<1x128xf32> to vector<2x128xf32>
    %349 = arith.addf %347, %348 : vector<2x128xf32>
    %350 = arith.negf %349 : vector<2x128xf32>
    %351 = math.exp %350 : vector<2x128xf32>
    %cst_73 = arith.constant 1.000000e+00 : f32
    %352 = vector.broadcast %cst_73 : f32 to vector<2x128xf32>
    %353 = arith.addf %352, %351 : vector<2x128xf32>
    %354 = arith.divf %352, %353 : vector<2x128xf32>
    %355 = vector.extract_strided_slice %354 {offsets = [0, 0], sizes = [2, 32], strides = [1, 1]} : vector<2x128xf32> to vector<2x32xf32>
    %356 = vector.extract_strided_slice %354 {offsets = [0, 32], sizes = [2, 32], strides = [1, 1]} : vector<2x128xf32> to vector<2x32xf32>
    %357 = vector.extract_strided_slice %354 {offsets = [0, 64], sizes = [2, 32], strides = [1, 1]} : vector<2x128xf32> to vector<2x32xf32>
    %cst_74 = arith.constant 2.000000e+00 : f32
    %358 = vector.broadcast %cst_74 : f32 to vector<2x32xf32>
    %359 = arith.mulf %358, %357 : vector<2x32xf32>
    %cst_75 = arith.constant 1.000000e+00 : f32
    %360 = vector.broadcast %cst_75 : f32 to vector<2x32xf32>
    %361 = arith.subf %359, %360 : vector<2x32xf32>
    %362 = vector.extract_strided_slice %354 {offsets = [0, 96], sizes = [2, 32], strides = [1, 1]} : vector<2x128xf32> to vector<2x32xf32>
    %363 = arith.mulf %356, %341 : vector<2x32xf32>
    %364 = arith.mulf %355, %361 : vector<2x32xf32>
    %365 = arith.addf %363, %364 : vector<2x32xf32>
    %366 = math.tanh %365 : vector<2x32xf32>
    %367 = arith.mulf %362, %366 : vector<2x32xf32>
    %c0_76 = arith.constant 0 : index
    %c224 = arith.constant 224 : index
    %368 = vector.load %arg6[%c0_76, %c224] : memref<2x256xf32, #tpu.memory_space<vmem>>, vector<2x32xf32>
    tpu.vector_store %arg6[%c0_76, %c224], %367 {strides = array<i32>} : memref<2x256xf32, #tpu.memory_space<vmem>>, vector<2x32xf32>,
    return
  }
  func.func @transform_0(%arg0: i32) -> (i32, i32) {
    %c0_i32 = arith.constant 0 : i32
    %c0_i32_0 = arith.constant 0 : i32
    %c0_i32_1 = arith.constant 0 : i32
    return %c0_i32, %c0_i32_0 : i32, i32
  }
  func.func @transform_1(%arg0: i32) -> (i32, i32) {
    %c0_i32 = arith.constant 0 : i32
    %c0_i32_0 = arith.constant 0 : i32
    %c0_i32_1 = arith.constant 0 : i32
    return %c0_i32, %c0_i32_0 : i32, i32
  }
  func.func @transform_2(%arg0: i32) -> (i32, i32) {
    %c0_i32 = arith.constant 0 : i32
    %c0_i32_0 = arith.constant 0 : i32
    %c0_i32_1 = arith.constant 0 : i32
    return %c0_i32, %c0_i32_0 : i32, i32
  }
  func.func @transform_3(%arg0: i32) -> (i32, i32) {
    %c0_i32 = arith.constant 0 : i32
    %c0_i32_0 = arith.constant 0 : i32
    %c0_i32_1 = arith.constant 0 : i32
    return %c0_i32, %c0_i32_0 : i32, i32
  }
  func.func @transform_4(%arg0: i32) -> (i32, i32) {
    %c0_i32 = arith.constant 0 : i32
    %c0_i32_0 = arith.constant 0 : i32
    %c0_i32_1 = arith.constant 0 : i32
    return %c0_i32, %c0_i32_0 : i32, i32
  }
  func.func @transform_5(%arg0: i32) -> (i32, i32) {
    %c0_i32 = arith.constant 0 : i32
    %c0_i32_0 = arith.constant 0 : i32
    %c0_i32_1 = arith.constant 0 : i32
    return %c0_i32, %c0_i32_0 : i32, i32
  }
}

</mosaic_0001>

<bundles_post_ra>
// kernel: tpu_custom_call.1
= control target key start
LH: loop header
LB: loop body
LE: loop exit
PB: predicated region body
PF: predicated region fallthrough
CT: control target
= control target key end

     0   :  { %10 = vsyncpa [#allocation3], 0  ;;  %s2009_s0 = inlined_call_operand.vmem [shape: f32[16,4], index: 0, kind: input, shape index: {}]   ;;  %s2010_s1 = inlined_call_operand.vmem [shape: f32[4,128], index: 1, kind: input, shape index: {}]   ;;  %s2011_s2 = inlined_call_operand.vmem [shape: f32[1,128], index: 2, kind: input, shape index: {}]   ;;  %s2012_s3 = inlined_call_operand.hbm [shape: f32[64,256], index: 3, kind: input, shape index: {}]   ;;  %s2013_s4 = inlined_call_operand.vmem [shape: f32[1,128], index: 4, kind: input, shape index: {}]   ;;  %s2014_s5 = inlined_call_operand.hbm [shape: f32[2,256], index: 5, kind: output, shape index: {}]  }
   0x1   :  { %11 = vsyncpa [#allocation4], 0  ;;  %s1702_s18 = smov [#allocation2]   ;;  %s1654_s22 = scalar_lea.hbm %s2012_s3, 2048 }
   0x2   :  { %s23_s19 = sshll.u32 %s1702_s18, 4  ;;  %p1655_p0 = scmp.ne.s32.totalorder %s2012_s3, %s1654_s22  ;;  %s24_s19 = int_to_ptr.vmem [resolvable:$true] %s23_s19 }
   0x3   :  { %p1658_p1 = scmp.lt.u32.totalorder %s1654_s22, %s2012_s3 }
   0x5   :  { %p1660_p2 = pnand %p1658_p1, %p1655_p0 }
   0x7   :  { %1663 = shalt.err (!%p1660_p2)
}
   0x8   :  { %s1664_s27 = scalar_lea.vmem %s24_s19, 2048  ;;  %p1669_p4 = scmp.lt.s32.totalorder %s24_s19, %s24_s19 }
   0x9   :  { %p1665_p3 = scmp.ne.s32.totalorder %s24_s19, %s1664_s27  ;;  %p1670_p5 = scmp.lt.s32.totalorder %s1664_s27, %s1664_s27 }
   0xb   :  { %p1671_p6 = por %p1670_p5, %p1669_p4 }
   0xd   :  { %p1672_p7 = pnand %p1671_p6, %p1665_p3 }
   0xf   :  { %1675 = shalt.err (!%p1672_p7)
}
  0x10   :  { %s1703_s28 = smov 256   ;;  %s1704_s29 = smov 16  }
  0x11   :  { %29 = dma.hbm_to_vmem [thread:$0]  %s2012_s3, 2048, %s24_s19, [#allocation3], %s1703_s28, %s1703_s28, %s1704_s29  }
  0x12   :  { %1698 = dma.done.wait [#allocation3], 2048  }
  0x13   :  { %1699 = vsyncadd [#allocation3], 4294965248  ;;  %vm52_vm0 = vcmask 1043456   ;;  %vm45_vm1 = vcmask 31744   ;;  %v37_v0 = vld [vmem:[%s2010_s1] sm:$0xf] }
  0x14   :  { %v35_v1 = vld [vmem:[%s2009_s0] sm:$0xff]  ;;  %v36_v2 = vld [vmem:[%s2009_s0 + $0x8] sm:$0xff]  ;;  %1416 = vmatprep.subr.msk.mxu0 %vm52_vm0, %v37_v0  ;;  %s1705_s0 = smov 64   ;;  %s1706_s1 = smov 32   ;;  %v134_v20 = vld [vmem:[#allocation2 + $0x18] sm:$0xff]  ;;  %v1707_v44 = vmov 0.0  }
  0x15   :  { %1418 = vmatprep.mubr.msk.f32.mxu0 %vm45_vm1, %v35_v1  ;;  %1417 = vmatpush3.msk.msra.mxu0 %vm52_vm0, %v37_v0  ;;  %v1368_v3 = vld [vmem:[%s2011_s2] ss:$0 sm:$0xff]  ;;  %v132_v19 = vld [vmem:[#allocation2 + $0x8] sm:$0xff]  ;;  %v133_v23 = vld [vmem:[#allocation2 + $0x10] sm:$0xff]  ;;  %vm177_vm2 = vcmask 261120   ;;  %vm179_vm3 = vcmask 523264  }
  0x16   :  { %1419 = vmatmul.mubr.msk.f32.vlgmr.msra.gmra.mrb[0].mxu0 %vm45_vm1, %v36_v2  ;;  %v131_v21 = vld [vmem:[#allocation2] sm:$0xff]  ;;  %v1775_v22 = vpack.c.bf16 %v134_v20, %v132_v19  ;;  %v136_v24 = vld [vmem:[#allocation2 + $0x28] sm:$0xff]  ;;  %v138_v25 = vld [vmem:[#allocation2 + $0x38] sm:$0xff]  ;;  %247 = vmatprep.mubr.f32.mxu1 %v1707_v44  ;;  %vm329_vm4 = vcmask 254976   ;;  %vm484_vm5 = vcmask 517376   ;;  %vm639_vm6 = vcmask 779776  }
  0x17   :  { %v1777_v26 = vpack.c.bf16 %v133_v23, %v131_v21  ;;  %v1779_v27 = vpack.c.bf16 %v138_v25, %v136_v24  ;;  %v135_v28 = vld [vmem:[#allocation2 + $0x20] sm:$0xff]  ;;  %v137_v29 = vld [vmem:[#allocation2 + $0x30] sm:$0xff]  ;;  %v140_v30 = vld [vmem:[#allocation2 + $0x48] sm:$0xff]  ;;  %408 = vmatprep.mubr.f32.mxu0 %v1707_v44  ;;  %vm780_vm7 = vcmask 1042176   ;;  %s1710_s15 = smov [#allocation5]  }
  0x18   :  { %1422 = vmatprep.subr.bf16.mxu1 %v1775_v22  ;;  %v142_v31 = vld [vmem:[#allocation2 + $0x58] sm:$0xff]  ;;  %1438 = vmatprep.subr.bf16.mxu0 %v1775_v22  ;;  %v1784_v32 = vpack.c.bf16 %v137_v29, %v135_v28  ;;  %v139_v34 = vld [vmem:[#allocation2 + $0x40] sm:$0xff]  ;;  %v141_v35 = vld [vmem:[#allocation2 + $0x50] sm:$0xff]  ;;  %s1359_s16 = sshll.u32 %s1710_s15, 4  ;;  %s1360_s16 = int_to_ptr.vmem [resolvable:$true] %s1359_s16 }
  0x19   :  { %1424 = vmatpush1.bf16.msra.mxu1 %v1777_v26  ;;  %1440 = vmatpush1.bf16.msra.mxu0 %v1777_v26  ;;  %v1788_v33 = vpack.c.bf16 %v142_v31, %v140_v30  ;;  %v144_v36 = vld [vmem:[#allocation2 + $0x68] sm:$0xff]  ;;  %v146_v37 = vld [vmem:[#allocation2 + $0x78] sm:$0xff]  ;;  %v1792_v38 = vpack.c.bf16 %v141_v35, %v139_v34  ;;  %v143_v40 = vld [vmem:[#allocation2 + $0x60] sm:$0xff]  ;;  %s1676_s17 = scalar_lea.vmem %s1360_s16, 64  ;;  %p1681_p9 = scmp.lt.s32.totalorder %s1360_s16, %s1360_s16 }
  0x1a   :  { %1426 = vmatprep.subr.bf16.mxu1 %v1779_v27  ;;  %1442 = vmatprep.subr.bf16.mxu0 %v1779_v27  ;;  %v1796_v39 = vpack.c.bf16 %v146_v37, %v144_v36  ;;  %v145_v41 = vld [vmem:[#allocation2 + $0x70] sm:$0xff]  ;;  %v1827_v49 = vld [vmem:[%s2013_s4] ss:$0 sm:$0xff]  ;;  %s1709_s4 = smov 96   ;;  %p1677_p8 = scmp.ne.s32.totalorder %s1360_s16, %s1676_s17 }
  0x1b   :  { %v1801_v43 = vpack.c.bf16 %v145_v41, %v143_v40  ;;  %p1682_p10 = scmp.lt.s32.totalorder %s1676_s17, %s1676_s17 }
  0x1d   :  { %1428 = vmatpush1.bf16.msra.mxu1 %v1784_v32  ;;  %1444 = vmatpush1.bf16.msra.mxu0 %v1784_v32  ;;  %p1683_p11 = por %p1682_p10, %p1681_p9 }
  0x1e   :  { %1430 = vmatprep.subr.bf16.mxu1 %v1788_v33  ;;  %1446 = vmatprep.subr.bf16.mxu0 %v1788_v33 }
  0x1f   :  { %p1684_p12 = pnand %p1683_p11, %p1677_p8 }
  0x21   :  { %1432 = vmatpush1.bf16.msra.mxu1 %v1792_v38  ;;  %1448 = vmatpush1.bf16.msra.mxu0 %v1792_v38 }
  0x22   :  { %1434 = vmatprep.subr.bf16.mxu1 %v1796_v39  ;;  %1450 = vmatprep.subr.bf16.mxu0 %v1796_v39 }
  0x25   :  { %1436 = vmatpush1.bf16.msra.mxu1 %v1801_v43  ;;  %1452 = vmatpush1.bf16.msra.mxu0 %v1801_v43 }
  0x26   :  { %1454 = vmatprep.subr.bf16.mxu1 %v1775_v22  ;;  %1470 = vmatprep.subr.bf16.mxu0 %v1775_v22 }
  0xe9   :  { %v1420_v4 = vpop.f32.mrb[0].mxu0 }
  0xea   :  { %v1765_v5 = vadd.f32 %v1420_v4, %v1368_v3  ;;  %v122_v6 = vpop.f32.mrb[1].mxu0 }
  0xeb   :  { %v1767_v7 = vadd.f32 %v1368_v3, %v122_v6 }
  0xed   :  { %v1372_v8 = vmul.f32 -1.442695, %v1767_v7 }
  0xef   :  { %1558 = vpow2.f32 %v1372_v8 }
  0xf9   :  { %v1559_v9 = vpop.eup %1558 }
  0xfa   :  { %v151_v10 = vadd.f32 1.0, %v1559_v9 }
  0xfc   :  { %1560 = vrcp.f32 %v151_v10 }
 0x106   :  { %v1561_v11 = vpop.eup %1560 }
 0x107   :  { %v154_v12 = vmul.f32 2.0, %v1561_v11  ;;  %v156_v16 = vmul.f32 0.0, %v1561_v11 }
 0x109   :  { %v1373_v13 = vadd.f32 -1.0, %v154_v12 }
 0x10b   :  { %158 = vrot.lane.b32.xlu0 %v1373_v13, %s1705_s0 }
 0x17d   :  { %v159_v14 = vpop.permute.xlu0 %158 }
 0x17e   :  { %v161_v15 = vmul.f32 %v1561_v11, %v159_v14 }
 0x180   :  { %163 = vrot.lane.b32.xlu0 %v161_v15, %s1706_s1 }
 0x1f2   :  { %v164_v17 = vpop.permute.xlu0 %163 }
 0x1f3   :  { %v1772_v18 = vadd.f32 %v164_v17, %v156_v16 }
 0x1f5   :  { %1562 = vtanh.f32 %v1772_v18  ;;  %v267_v9 = vrot.slane %v1772_v18, 6 }
 0x1ff   :  { %v1563_v42 = vpop.eup %1562 }
 0x200   :  { %169 = vrot.lane.b32.xlu1 %v1563_v42, %s1705_s0 }
 0x272   :  { %v170_v45 = vpop.permute.xlu1 %169 }
 0x273   :  { %v172_v46 = vmul.f32 %v1561_v11, %v170_v45 }
 0x275   :  { %174 = vrot.lane.b32.xlu1 %v172_v46, %s1706_s1 }
 0x2e7   :  { %v175_v47 = vpop.permute.xlu1 %174 }
 0x2e8   :  { %v178_v48 = vsel %vm177_vm2, %v175_v47, 0.0 }
 0x2e9   :  { %1374 = vmatmul.mubr.msk.f32.vlgmr.msra.gmra.mrb[0].mxu1 %vm179_vm3, %v178_v48 }
 0x2ea   :  { %1456 = vmatpush1.bf16.msra.mxu1 %v1777_v26  ;;  %563 = vmatprep.mubr.f32.mxu1 %v1707_v44 }
 0x2eb   :  { %1458 = vmatprep.subr.bf16.mxu1 %v1779_v27 }
 0x2ee   :  { %1460 = vmatpush1.bf16.msra.mxu1 %v1784_v32 }
 0x2ef   :  { %1462 = vmatprep.subr.bf16.mxu1 %v1788_v33 }
 0x2f2   :  { %1464 = vmatpush1.bf16.msra.mxu1 %v1792_v38 }
 0x2f3   :  { %1466 = vmatprep.subr.bf16.mxu1 %v1796_v39 }
 0x2f6   :  { %1468 = vmatpush1.bf16.msra.mxu1 %v1801_v43 }
 0x2f7   :  { %1486 = vmatprep.subr.bf16.mxu1 %v1775_v22 }
 0x3bc   :  { %v249_v50 = vpop.f32.mrb[0].mxu1 }
 0x3bd   :  { %v255_v51 = vrot.slane %v249_v50, 6  ;;  %v251_v52 = vpop.f32.mrb[1].mxu1 }
 0x3be   :  { %v292_v53 = vadd.f32 %v1827_v49, %v251_v52 }
 0x3bf   :  { %v257_v54 = vadd.f32 %v255_v51, %v1767_v7 }
 0x3c0   :  { %v1378_v55 = vmul.f32 -1.442695, %v292_v53 }
 0x3c1   :  { %v1375_v56 = vmul.f32 -1.442695, %v257_v54 }
 0x3c2   :  { %1564 = vpow2.f32 %v1378_v55 }
 0x3c3   :  { %1566 = vpow2.f32 %v1375_v56 }
 0x3cc   :  { %v1565_v57 = vpop.eup %1564 }
 0x3cd   :  { %v1567_v58 = vpop.eup %1566  ;;  %v296_v59 = vadd.f32 1.0, %v1565_v57 }
 0x3ce   :  { %v261_v60 = vadd.f32 1.0, %v1567_v58 }
 0x3cf   :  { %1568 = vrcp.f32 %v296_v59 }
 0x3d0   :  { %1570 = vrcp.f32 %v261_v60 }
 0x3d9   :  { %v1569_v61 = vpop.eup %1568 }
 0x3da   :  { %v1571_v62 = vpop.eup %1570  ;;  %v299_v63 = vmul.f32 2.0, %v1569_v61  ;;  %v301_v10 = vmul.f32 0.0, %v1569_v61 }
 0x3db   :  { %v264_v0 = vmul.f32 2.0, %v1571_v62  ;;  %v269_v12 = vmul.f32 %v1571_v62, %v267_v9 }
 0x3dc   :  { %v1379_v1 = vadd.f32 -1.0, %v299_v63 }
 0x3dd   :  { %v1376_v2 = vadd.f32 -1.0, %v264_v0 }
 0x3de   :  { %303 = vrot.lane.b32.xlu0 %v1379_v1, %s1705_s0 }
 0x3df   :  { %271 = vrot.lane.b32.xlu1 %v1376_v2, %s1705_s0 }
 0x450   :  { %v304_v3 = vpop.permute.xlu0 %303 }
 0x451   :  { %v306_v4 = vmul.f32 %v1569_v61, %v304_v3  ;;  %v272_v6 = vpop.permute.xlu1 %271 }
 0x452   :  { %v274_v8 = vmul.f32 %v1571_v62, %v272_v6 }
 0x453   :  { %308 = vrot.lane.b32.xlu0 %v306_v4, %s1706_s1 }
 0x454   :  { %276 = vrot.lane.b32.xlu1 %v274_v8, %s1706_s1 }
 0x4c5   :  { %v309_v11 = vpop.permute.xlu0 %308 }
 0x4c6   :  { %v311_v13 = vadd.f32 %v309_v11, %v301_v10  ;;  %v277_v14 = vpop.permute.xlu1 %276 }
 0x4c7   :  { %v279_v15 = vadd.f32 %v277_v14, %v269_v12 }
 0x4c8   :  { %1572 = vtanh.f32 %v311_v13 }
 0x4c9   :  { %1574 = vtanh.f32 %v279_v15  ;;  %v428_v58 = vrot.slane %v279_v15, 6 }
 0x4d2   :  { %v1573_v16 = vpop.eup %1572 }
 0x4d3   :  { %v1575_v17 = vpop.eup %1574  ;;  %314 = vrot.lane.b32.xlu0 %v1573_v16, %s1705_s0 }
 0x4d4   :  { %282 = vrot.lane.b32.xlu1 %v1575_v17, %s1705_s0 }
 0x545   :  { %v315_v19 = vpop.permute.xlu0 %314 }
 0x546   :  { %v1838_v20 = vmul.f32 %v1569_v61, %v315_v19  ;;  %v283_v21 = vpop.permute.xlu1 %282 }
 0x547   :  { %v285_v23 = vmul.f32 %v1571_v62, %v283_v21 }
 0x548   :  { %v335_v18 = vrot.slane %v1838_v20, 6 }
 0x549   :  { %332 = vrot.lane.b32.xlu0 %v285_v23, %s1706_s1 }
 0x54a   :  { %336 = vrot.lane.b32.xlu1 %v335_v18, %s1705_s0 }
 0x5bb   :  { %v333_v24 = vpop.permute.xlu0 %332 }
 0x5bc   :  { %v337_v25 = vpop.permute.xlu1 %336 }
 0x5bd   :  { %v339_v28 = vsel %vm177_vm2, %v333_v24, %v337_v25 }
 0x5be   :  { %v341_v29 = vrot.slane %v339_v28, 2 }
 0x5c0   :  { %1380 = vmatmul.mubr.msk.f32.vlgmr.msra.gmra.mrb[2].mxu0 %vm179_vm3, %v341_v29 }
 0x5c1   :  { %1472 = vmatpush1.bf16.msra.mxu0 %v1777_v26  ;;  %718 = vmatprep.mubr.f32.mxu0 %v1707_v44 }
 0x5c2   :  { %1474 = vmatprep.subr.bf16.mxu0 %v1779_v27 }
 0x5c5   :  { %1476 = vmatpush1.bf16.msra.mxu0 %v1784_v32 }
 0x5c6   :  { %1478 = vmatprep.subr.bf16.mxu0 %v1788_v33 }
 0x5c9   :  { %1480 = vmatpush1.bf16.msra.mxu0 %v1792_v38 }
 0x5ca   :  { %1482 = vmatprep.subr.bf16.mxu0 %v1796_v39 }
 0x5cd   :  { %1484 = vmatpush1.bf16.msra.mxu0 %v1801_v43 }
 0x5ce   :  { %1502 = vmatprep.subr.bf16.mxu0 %v1775_v22 }
 0x693   :  { %v410_v30 = vpop.f32.mrb[2].mxu0 }
 0x694   :  { %v416_v31 = vrot.slane %v410_v30, 4  ;;  %v412_v34 = vpop.f32.mrb[3].mxu0 }
 0x695   :  { %v447_v35 = vadd.f32 %v1827_v49, %v412_v34 }
 0x696   :  { %v418_v36 = vadd.f32 %v416_v31, %v1767_v7 }
 0x697   :  { %v1383_v37 = vmul.f32 -1.442695, %v447_v35 }
 0x698   :  { %v1381_v40 = vmul.f32 -1.442695, %v418_v36 }
 0x699   :  { %1576 = vpow2.f32 %v1383_v37 }
 0x69a   :  { %1578 = vpow2.f32 %v1381_v40 }
 0x6a3   :  { %v1577_v41 = vpop.eup %1576 }
 0x6a4   :  { %v1579_v42 = vpop.eup %1578  ;;  %v451_v45 = vadd.f32 1.0, %v1577_v41 }
 0x6a5   :  { %v422_v46 = vadd.f32 1.0, %v1579_v42 }
 0x6a6   :  { %1580 = vrcp.f32 %v451_v45 }
 0x6a7   :  { %1582 = vrcp.f32 %v422_v46 }
 0x6b0   :  { %v1581_v47 = vpop.eup %1580 }
 0x6b1   :  { %v1583_v48 = vpop.eup %1582  ;;  %v454_v50 = vmul.f32 2.0, %v1581_v47  ;;  %v456_v59 = vmul.f32 %v1581_v47, %v311_v13 }
 0x6b2   :  { %v425_v51 = vmul.f32 2.0, %v1583_v48  ;;  %v430_v61 = vmul.f32 %v1583_v48, %v428_v58 }
 0x6b3   :  { %v1384_v52 = vadd.f32 -1.0, %v454_v50 }
 0x6b4   :  { %v1382_v53 = vadd.f32 -1.0, %v425_v51 }
 0x6b5   :  { %458 = vrot.lane.b32.xlu0 %v1384_v52, %s1705_s0 }
 0x6b6   :  { %432 = vrot.lane.b32.xlu1 %v1382_v53, %s1705_s0 }
 0x727   :  { %v459_v54 = vpop.permute.xlu0 %458 }
 0x728   :  { %v461_v55 = vmul.f32 %v1581_v47, %v459_v54  ;;  %v433_v56 = vpop.permute.xlu1 %432 }
 0x729   :  { %v435_v57 = vmul.f32 %v1583_v48, %v433_v56 }
 0x72a   :  { %463 = vrot.lane.b32.xlu0 %v461_v55, %s1706_s1 }
 0x72b   :  { %437 = vrot.lane.b32.xlu1 %v435_v57, %s1706_s1 }
 0x79c   :  { %v464_v60 = vpop.permute.xlu0 %463 }
 0x79d   :  { %v466_v62 = vadd.f32 %v464_v60, %v456_v59  ;;  %v438_v63 = vpop.permute.xlu1 %437 }
 0x79e   :  { %v440_v0 = vadd.f32 %v438_v63, %v430_v61 }
 0x79f   :  { %1584 = vtanh.f32 %v466_v62 }
 0x7a0   :  { %1586 = vtanh.f32 %v440_v0  ;;  %v583_v42 = vrot.slane %v440_v0, 6 }
 0x7a9   :  { %v1585_v1 = vpop.eup %1584 }
 0x7aa   :  { %v1587_v2 = vpop.eup %1586  ;;  %469 = vrot.lane.b32.xlu0 %v1585_v1, %s1705_s0 }
 0x7ab   :  { %443 = vrot.lane.b32.xlu1 %v1587_v2, %s1705_s0 }
 0x81c   :  { %v470_v3 = vpop.permute.xlu0 %469 }
 0x81d   :  { %v1862_v4 = vmul.f32 %v1581_v47, %v470_v3  ;;  %v444_v6 = vpop.permute.xlu1 %443 }
 0x81e   :  { %v446_v8 = vmul.f32 %v1583_v48, %v444_v6 }
 0x81f   :  { %v490_v9 = vrot.slane %v1862_v4, 4 }
 0x820   :  { %487 = vrot.lane.b32.xlu0 %v446_v8, %s1706_s1 }
 0x821   :  { %491 = vrot.lane.b32.xlu1 %v490_v9, %s1705_s0 }
 0x892   :  { %v488_v10 = vpop.permute.xlu0 %487 }
 0x893   :  { %v492_v11 = vpop.permute.xlu1 %491 }
 0x894   :  { %v494_v12 = vsel %vm177_vm2, %v488_v10, %v492_v11 }
 0x895   :  { %v496_v13 = vrot.slane %v494_v12, 4 }
 0x897   :  { %1385 = vmatmul.mubr.msk.f32.vlgmr.msra.gmra.mrb[2].mxu1 %vm179_vm3, %v496_v13 }
 0x898   :  { %1488 = vmatpush1.bf16.msra.mxu1 %v1777_v26  ;;  %858 = vmatprep.mubr.f32.mxu1 %v1707_v44 }
 0x899   :  { %1490 = vmatprep.subr.bf16.mxu1 %v1779_v27 }
 0x89c   :  { %1492 = vmatpush1.bf16.msra.mxu1 %v1784_v32 }
 0x89d   :  { %1494 = vmatprep.subr.bf16.mxu1 %v1788_v33 }
 0x8a0   :  { %1496 = vmatpush1.bf16.msra.mxu1 %v1792_v38 }
 0x8a1   :  { %1498 = vmatprep.subr.bf16.mxu1 %v1796_v39 }
 0x8a4   :  { %1500 = vmatpush1.bf16.msra.mxu1 %v1801_v43 }
 0x8a5   :  { %1518 = vmatprep.subr.bf16.mxu1 %v1775_v22 }
 0x96a   :  { %v565_v14 = vpop.f32.mrb[2].mxu1 }
 0x96b   :  { %v571_v15 = vrot.slane %v565_v14, 2  ;;  %v567_v16 = vpop.f32.mrb[3].mxu1 }
 0x96c   :  { %v602_v17 = vadd.f32 %v1827_v49, %v567_v16 }
 0x96d   :  { %v573_v19 = vadd.f32 %v571_v15, %v1767_v7 }
 0x96e   :  { %v1388_v21 = vmul.f32 -1.442695, %v602_v17 }
 0x96f   :  { %v1386_v23 = vmul.f32 -1.442695, %v573_v19 }
 0x970   :  { %1588 = vpow2.f32 %v1388_v21 }
 0x971   :  { %1590 = vpow2.f32 %v1386_v23 }
 0x97a   :  { %v1589_v18 = vpop.eup %1588 }
 0x97b   :  { %v1591_v24 = vpop.eup %1590  ;;  %v606_v25 = vadd.f32 1.0, %v1589_v18 }
 0x97c   :  { %v577_v28 = vadd.f32 1.0, %v1591_v24 }
 0x97d   :  { %1592 = vrcp.f32 %v606_v25 }
 0x97e   :  { %1594 = vrcp.f32 %v577_v28 }
 0x987   :  { %v1593_v29 = vpop.eup %1592 }
 0x988   :  { %v1595_v30 = vpop.eup %1594  ;;  %v609_v31 = vmul.f32 2.0, %v1593_v29  ;;  %v611_v45 = vmul.f32 %v1593_v29, %v466_v62 }
 0x989   :  { %v580_v34 = vmul.f32 2.0, %v1595_v30  ;;  %v585_v47 = vmul.f32 %v1595_v30, %v583_v42 }
 0x98a   :  { %v1389_v35 = vadd.f32 -1.0, %v609_v31 }
 0x98b   :  { %v1387_v36 = vadd.f32 -1.0, %v580_v34 }
 0x98c   :  { %613 = vrot.lane.b32.xlu0 %v1389_v35, %s1705_s0 }
 0x98d   :  { %587 = vrot.lane.b32.xlu1 %v1387_v36, %s1705_s0 }
 0x9fe   :  { %v614_v7 = vpop.permute.xlu0 %613 }
 0x9ff   :  { %v616_v37 = vmul.f32 %v1593_v29, %v614_v7  ;;  %v588_v40 = vpop.permute.xlu1 %587 }
 0xa00   :  { %v590_v41 = vmul.f32 %v1595_v30, %v588_v40 }
 0xa01   :  { %618 = vrot.lane.b32.xlu0 %v616_v37, %s1706_s1 }
 0xa02   :  { %592 = vrot.lane.b32.xlu1 %v590_v41, %s1706_s1 }
 0xa73   :  { %v619_v46 = vpop.permute.xlu0 %618 }
 0xa74   :  { %v621_v48 = vadd.f32 %v619_v46, %v611_v45  ;;  %v593_v50 = vpop.permute.xlu1 %592 }
 0xa75   :  { %v595_v51 = vadd.f32 %v593_v50, %v585_v47 }
 0xa76   :  { %1596 = vtanh.f32 %v621_v48 }
 0xa77   :  { %1598 = vtanh.f32 %v595_v51  ;;  %v735_v18 = vrot.slane %v595_v51, 6 }
 0xa80   :  { %v1597_v52 = vpop.eup %1596 }
 0xa81   :  { %v1599_v53 = vpop.eup %1598  ;;  %624 = vrot.lane.b32.xlu0 %v1597_v52, %s1705_s0 }
 0xa82   :  { %598 = vrot.lane.b32.xlu1 %v1599_v53, %s1705_s0 }
 0xaf3   :  { %v625_v54 = vpop.permute.xlu0 %624 }
 0xaf4   :  { %v1886_v55 = vmul.f32 %v1593_v29, %v625_v54  ;;  %v599_v56 = vpop.permute.xlu1 %598 }
 0xaf5   :  { %v601_v57 = vmul.f32 %v1595_v30, %v599_v56 }
 0xaf6   :  { %v645_v58 = vrot.slane %v1886_v55, 2 }
 0xaf7   :  { %642 = vrot.lane.b32.xlu0 %v601_v57, %s1706_s1 }
 0xaf8   :  { %646 = vrot.lane.b32.xlu1 %v645_v58, %s1705_s0 }
 0xb69   :  { %v643_v59 = vpop.permute.xlu0 %642 }
 0xb6a   :  { %v647_v60 = vpop.permute.xlu1 %646 }
 0xb6b   :  { %v649_v61 = vsel %vm177_vm2, %v643_v59, %v647_v60 }
 0xb6c   :  { %v651_v62 = vrot.slane %v649_v61, 6 }
 0xb6e   :  { %1390 = vmatmul.mubr.msk.f32.vlgmr.msra.gmra.mrb[4].mxu0 %vm179_vm3, %v651_v62 }
 0xb6f   :  { %1504 = vmatpush1.bf16.msra.mxu0 %v1777_v26  ;;  %1012 = vmatprep.mubr.f32.mxu0 %v1707_v44 }
 0xb70   :  { %1506 = vmatprep.subr.bf16.mxu0 %v1779_v27 }
 0xb73   :  { %1508 = vmatpush1.bf16.msra.mxu0 %v1784_v32 }
 0xb74   :  { %1510 = vmatprep.subr.bf16.mxu0 %v1788_v33 }
 0xb77   :  { %1512 = vmatpush1.bf16.msra.mxu0 %v1792_v38 }
 0xb78   :  { %1514 = vmatprep.subr.bf16.mxu0 %v1796_v39 }
 0xb7b   :  { %1516 = vmatpush1.bf16.msra.mxu0 %v1801_v43 }
 0xb7c   :  { %1534 = vmatprep.subr.bf16.mxu0 %v1775_v22 }
 0xc41   :  { %v720_v63 = vpop.f32.mrb[4].mxu0 }
 0xc42   :  { %v725_v0 = vadd.f32 %v720_v63, %v1765_v5  ;;  %v722_v1 = vpop.f32.mrb[5].mxu0 }
 0xc43   :  { %v754_v2 = vadd.f32 %v1827_v49, %v722_v1 }
 0xc44   :  { %v1391_v3 = vmul.f32 -1.442695, %v725_v0 }
 0xc45   :  { %v1393_v6 = vmul.f32 -1.442695, %v754_v2 }
 0xc46   :  { %1600 = vpow2.f32 %v1391_v3 }
 0xc47   :  { %1602 = vpow2.f32 %v1393_v6 }
 0xc50   :  { %v1601_v8 = vpop.eup %1600 }
 0xc51   :  { %v1603_v9 = vpop.eup %1602  ;;  %v729_v10 = vadd.f32 1.0, %v1601_v8 }
 0xc52   :  { %v758_v11 = vadd.f32 1.0, %v1603_v9 }
 0xc53   :  { %1604 = vrcp.f32 %v729_v10 }
 0xc54   :  { %1606 = vrcp.f32 %v758_v11 }
 0xc5d   :  { %v1605_v12 = vpop.eup %1604 }
 0xc5e   :  { %v1607_v13 = vpop.eup %1606  ;;  %v732_v14 = vmul.f32 2.0, %v1605_v12  ;;  %v737_v24 = vmul.f32 %v1605_v12, %v735_v18 }
 0xc5f   :  { %v761_v22 = vmul.f32 2.0, %v1607_v13  ;;  %v763_v28 = vmul.f32 %v1607_v13, %v621_v48 }
 0xc60   :  { %v1392_v15 = vadd.f32 -1.0, %v732_v14 }
 0xc61   :  { %v1394_v16 = vadd.f32 -1.0, %v761_v22 }
 0xc62   :  { %739 = vrot.lane.b32.xlu0 %v1392_v15, %s1705_s0 }
 0xc63   :  { %765 = vrot.lane.b32.xlu1 %v1394_v16, %s1705_s0 }
 0xcd4   :  { %v740_v17 = vpop.permute.xlu0 %739 }
 0xcd5   :  { %v742_v19 = vmul.f32 %v1605_v12, %v740_v17  ;;  %v766_v21 = vpop.permute.xlu1 %765 }
 0xcd6   :  { %v768_v23 = vmul.f32 %v1607_v13, %v766_v21 }
 0xcd7   :  { %744 = vrot.lane.b32.xlu0 %v742_v19, %s1706_s1 }
 0xcd8   :  { %770 = vrot.lane.b32.xlu1 %v768_v23, %s1706_s1 }
 0xd49   :  { %v745_v25 = vpop.permute.xlu0 %744 }
 0xd4a   :  { %v747_v29 = vadd.f32 %v745_v25, %v737_v24  ;;  %v771_v30 = vpop.permute.xlu1 %770 }
 0xd4b   :  { %v773_v31 = vadd.f32 %v771_v30, %v763_v28 }
 0xd4c   :  { %1608 = vtanh.f32 %v747_v29  ;;  %v878_v8 = vrot.slane %v747_v29, 6 }
 0xd4d   :  { %1610 = vtanh.f32 %v773_v31 }
 0xd56   :  { %v1609_v34 = vpop.eup %1608 }
 0xd57   :  { %v1611_v35 = vpop.eup %1610  ;;  %750 = vrot.lane.b32.xlu0 %v1609_v34, %s1705_s0 }
 0xd58   :  { %776 = vrot.lane.b32.xlu1 %v1611_v35, %s1705_s0 }
 0xdc9   :  { %v751_v36 = vpop.permute.xlu0 %750 }
 0xdca   :  { %v753_v7 = vmul.f32 %v1605_v12, %v751_v36  ;;  %v777_v37 = vpop.permute.xlu1 %776 }
 0xdcb   :  { %v1910_v40 = vmul.f32 %v1607_v13, %v777_v37 }
 0xdcc   :  { %783 = vrot.lane.b32.xlu0 %v753_v7, %s1706_s1 }
 0xdcd   :  { %787 = vrot.lane.b32.xlu1 %v1910_v40, %s1705_s0 }
 0xe3e   :  { %v784_v41 = vpop.permute.xlu0 %783 }
 0xe3f   :  { %v788_v42 = vpop.permute.xlu1 %787 }
 0xe40   :  { %v790_v45 = vsel %vm177_vm2, %v784_v41, %v788_v42 }
 0xe41   :  { %1395 = vmatmul.mubr.msk.f32.vlgmr.msra.gmra.mrb[4].mxu1 %vm179_vm3, %v790_v45 }
 0xe42   :  { %1520 = vmatpush1.bf16.msra.mxu1 %v1777_v26  ;;  %1166 = vmatprep.mubr.f32.mxu1 %v1707_v44 }
 0xe43   :  { %1522 = vmatprep.subr.bf16.mxu1 %v1779_v27 }
 0xe46   :  { %1524 = vmatpush1.bf16.msra.mxu1 %v1784_v32 }
 0xe47   :  { %1526 = vmatprep.subr.bf16.mxu1 %v1788_v33 }
 0xe4a   :  { %1528 = vmatpush1.bf16.msra.mxu1 %v1792_v38 }
 0xe4b   :  { %1530 = vmatprep.subr.bf16.mxu1 %v1796_v39 }
 0xe4e   :  { %1532 = vmatpush1.bf16.msra.mxu1 %v1801_v43 }
 0xf14   :  { %v860_v46 = vpop.f32.mrb[4].mxu1 }
 0xf15   :  { %v866_v47 = vrot.slane %v860_v46, 6  ;;  %v862_v48 = vpop.f32.mrb[5].mxu1 }
 0xf16   :  { %v897_v50 = vadd.f32 %v1827_v49, %v862_v48 }
 0xf17   :  { %v868_v51 = vadd.f32 %v866_v47, %v1765_v5 }
 0xf18   :  { %v1398_v52 = vmul.f32 -1.442695, %v897_v50 }
 0xf19   :  { %v1396_v53 = vmul.f32 -1.442695, %v868_v51 }
 0xf1a   :  { %1612 = vpow2.f32 %v1398_v52 }
 0xf1b   :  { %1614 = vpow2.f32 %v1396_v53 }
 0xf24   :  { %v1613_v54 = vpop.eup %1612 }
 0xf25   :  { %v1615_v56 = vpop.eup %1614  ;;  %v901_v57 = vadd.f32 1.0, %v1613_v54 }
 0xf26   :  { %v872_v58 = vadd.f32 1.0, %v1615_v56 }
 0xf27   :  { %1616 = vrcp.f32 %v901_v57 }
 0xf28   :  { %1618 = vrcp.f32 %v872_v58 }
 0xf31   :  { %v1617_v59 = vpop.eup %1616 }
 0xf32   :  { %v1619_v60 = vpop.eup %1618  ;;  %v904_v61 = vmul.f32 2.0, %v1617_v59  ;;  %v906_v9 = vmul.f32 %v1617_v59, %v773_v31 }
 0xf33   :  { %v875_v62 = vmul.f32 2.0, %v1619_v60  ;;  %v880_v11 = vmul.f32 %v1619_v60, %v878_v8 }
 0xf34   :  { %v1399_v63 = vadd.f32 -1.0, %v904_v61 }
 0xf35   :  { %v1397_v0 = vadd.f32 -1.0, %v875_v62 }
 0xf36   :  { %908 = vrot.lane.b32.xlu0 %v1399_v63, %s1705_s0 }
 0xf37   :  { %882 = vrot.lane.b32.xlu1 %v1397_v0, %s1705_s0 }
 0xfa8   :  { %v909_v1 = vpop.permute.xlu0 %908 }
 0xfa9   :  { %v911_v2 = vmul.f32 %v1617_v59, %v909_v1  ;;  %v883_v3 = vpop.permute.xlu1 %882 }
 0xfaa   :  { %v885_v6 = vmul.f32 %v1619_v60, %v883_v3 }
 0xfab   :  { %913 = vrot.lane.b32.xlu0 %v911_v2, %s1706_s1 }
 0xfac   :  { %887 = vrot.lane.b32.xlu1 %v885_v6, %s1706_s1 }
0x101d   :  { %v914_v10 = vpop.permute.xlu0 %913 }
0x101e   :  { %v916_v12 = vadd.f32 %v914_v10, %v906_v9  ;;  %v888_v13 = vpop.permute.xlu1 %887 }
0x101f   :  { %v890_v14 = vadd.f32 %v888_v13, %v880_v11 }
0x1020   :  { %1620 = vtanh.f32 %v916_v12 }
0x1021   :  { %1622 = vtanh.f32 %v890_v14  ;;  %v1032_v48 = vrot.slane %v890_v14, 6 }
0x102a   :  { %v1621_v22 = vpop.eup %1620 }
0x102b   :  { %v1623_v15 = vpop.eup %1622  ;;  %919 = vrot.lane.b32.xlu0 %v1621_v22, %s1705_s0 }
0x102c   :  { %893 = vrot.lane.b32.xlu1 %v1623_v15, %s1705_s0 }
0x109d   :  { %v920_v16 = vpop.permute.xlu0 %919 }
0x109e   :  { %v1933_v17 = vmul.f32 %v1617_v59, %v920_v16  ;;  %v894_v19 = vpop.permute.xlu1 %893 }
0x109f   :  { %v896_v21 = vmul.f32 %v1619_v60, %v894_v19 }
0x10a0   :  { %v939_v23 = vrot.slane %v1933_v17, 6 }
0x10a1   :  { %936 = vrot.lane.b32.xlu0 %v896_v21, %s1706_s1 }
0x10a2   :  { %940 = vrot.lane.b32.xlu1 %v939_v23, %s1705_s0 }
0x1113   :  { %v937_v18 = vpop.permute.xlu0 %936 }
0x1114   :  { %v941_v24 = vpop.permute.xlu1 %940 }
0x1115   :  { %v943_v25 = vsel %vm177_vm2, %v937_v18, %v941_v24 }
0x1116   :  { %v945_v28 = vrot.slane %v943_v25, 2 }
0x1118   :  { %1400 = vmatmul.mubr.msk.f32.vlgmr.msra.gmra.mrb[6].mxu0 %vm179_vm3, %v945_v28 }
0x1119   :  { %1536 = vmatpush1.bf16.msra.mxu0 %v1777_v26  ;;  %1320 = vmatprep.mubr.f32.mxu0 %v1707_v44 }
0x111a   :  { %1538 = vmatprep.subr.bf16.mxu0 %v1779_v27 }
0x111d   :  { %1540 = vmatpush1.bf16.msra.mxu0 %v1784_v32 }
0x111e   :  { %1542 = vmatprep.subr.bf16.mxu0 %v1788_v33 }
0x1121   :  { %1544 = vmatpush1.bf16.msra.mxu0 %v1792_v38 }
0x1122   :  { %1546 = vmatprep.subr.bf16.mxu0 %v1796_v39 }
0x1125   :  { %1548 = vmatpush1.bf16.msra.mxu0 %v1801_v43 }
0x11eb   :  { %v1014_v29 = vpop.f32.mrb[6].mxu0 }
0x11ec   :  { %v1020_v30 = vrot.slane %v1014_v29, 4  ;;  %v1016_v31 = vpop.f32.mrb[7].mxu0 }
0x11ed   :  { %v1051_v34 = vadd.f32 %v1827_v49, %v1016_v31 }
0x11ee   :  { %v1022_v26 = vadd.f32 %v1020_v30, %v1765_v5 }
0x11ef   :  { %v1403_v44 = vmul.f32 -1.442695, %v1051_v34 }
0x11f0   :  { %v1401_v35 = vmul.f32 -1.442695, %v1022_v26 }
0x11f1   :  { %1624 = vpow2.f32 %v1403_v44 }
0x11f2   :  { %1626 = vpow2.f32 %v1401_v35 }
0x11fb   :  { %v1625_v27 = vpop.eup %1624 }
0x11fc   :  { %v1627_v32 = vpop.eup %1626  ;;  %v1055_v33 = vadd.f32 1.0, %v1625_v27 }
0x11fd   :  { %v1026_v36 = vadd.f32 1.0, %v1627_v32 }
0x11fe   :  { %1628 = vrcp.f32 %v1055_v33 }
0x11ff   :  { %1630 = vrcp.f32 %v1026_v36 }
0x1208   :  { %v1629_v38 = vpop.eup %1628 }
0x1209   :  { %v1631_v39 = vpop.eup %1630  ;;  %v1058_v43 = vmul.f32 2.0, %v1629_v38  ;;  %v1060_v50 = vmul.f32 %v1629_v38, %v916_v12 }
0x120a   :  { %v1029_v7 = vmul.f32 2.0, %v1631_v39  ;;  %v1034_v52 = vmul.f32 %v1631_v39, %v1032_v48 }
0x120b   :  { %v1404_v37 = vadd.f32 -1.0, %v1058_v43 }
0x120c   :  { %v1402_v41 = vadd.f32 -1.0, %v1029_v7 }
0x120d   :  { %1062 = vrot.lane.b32.xlu0 %v1404_v37, %s1705_s0 }
0x120e   :  { %1036 = vrot.lane.b32.xlu1 %v1402_v41, %s1705_s0 }
0x127f   :  { %v1063_v42 = vpop.permute.xlu0 %1062 }
0x1280   :  { %v1065_v45 = vmul.f32 %v1629_v38, %v1063_v42  ;;  %v1037_v46 = vpop.permute.xlu1 %1036 }
0x1281   :  { %v1039_v47 = vmul.f32 %v1631_v39, %v1037_v46 }
0x1282   :  { %1067 = vrot.lane.b32.xlu0 %v1065_v45, %s1706_s1 }
0x1283   :  { %1041 = vrot.lane.b32.xlu1 %v1039_v47, %s1706_s1 }
0x12f4   :  { %v1068_v51 = vpop.permute.xlu0 %1067 }
0x12f5   :  { %v1070_v53 = vadd.f32 %v1068_v51, %v1060_v50  ;;  %v1042_v54 = vpop.permute.xlu1 %1041 }
0x12f6   :  { %v1044_v56 = vadd.f32 %v1042_v54, %v1034_v52  ;;  %v1708_v54 = vmov 1983009808  }
0x12f7   :  { %1632 = vtanh.f32 %v1070_v53 }
0x12f8   :  { %1634 = vtanh.f32 %v1044_v56  ;;  %v1186_v31 = vrot.slane %v1044_v56, 6  ;;  %v320_v56 = vunpack.c.l.s4 %v1708_v54 }
0x1301   :  { %v1633_v57 = vpop.eup %1632 }
0x1302   :  { %v1635_v58 = vpop.eup %1634  ;;  %1073 = vrot.lane.b32.xlu0 %v1633_v57, %s1705_s0  ;;  %v322_v57 = vlaneseq }
0x1303   :  { %1047 = vrot.lane.b32.xlu1 %v1635_v58, %s1705_s0  ;;  %v321_v58 = vunpack.c.0.s8 %v320_v56 }
0x1374   :  { %v1074_v59 = vpop.permute.xlu0 %1073 }
0x1375   :  { %v1956_v60 = vmul.f32 %v1629_v38, %v1074_v59  ;;  %v1048_v61 = vpop.permute.xlu1 %1047  ;;  %v323_v59 = vshrl.u32 %v322_v57, 7 }
0x1376   :  { %v1050_v62 = vmul.f32 %v1631_v39, %v1048_v61 }
0x1377   :  { %v1093_v63 = vrot.slane %v1956_v60, 4 }
0x1378   :  { %1090 = vrot.lane.b32.xlu0 %v1050_v62, %s1706_s1 }
0x1379   :  { %1094 = vrot.lane.b32.xlu1 %v1093_v63, %s1705_s0  ;;  %v324_v63 = vsub.s32 %v321_v58, %v323_v59 }
0x13ea   :  { %v1091_v0 = vpop.permute.xlu0 %1090 }
0x13eb   :  { %v1095_v1 = vpop.permute.xlu1 %1094 }
0x13ec   :  { %v1097_v2 = vsel %vm177_vm2, %v1091_v0, %v1095_v1  ;;  %v325_v1 = vrot.slane %v1838_v20, %v324_v63 }
0x13ed   :  { %v1099_v3 = vrot.slane %v1097_v2, 4 }
0x13ef   :  { %1405 = vmatmul.mubr.msk.f32.vlgmr.msra.gmra.mrb[6].mxu1 %vm179_vm3, %v1099_v3 }
0x14c2   :  { %v1168_v6 = vpop.f32.mrb[6].mxu1 }
0x14c3   :  { %v1174_v8 = vrot.slane %v1168_v6, 2  ;;  %v1170_v9 = vpop.f32.mrb[7].mxu1 }
0x14c4   :  { %v1205_v10 = vadd.f32 %v1827_v49, %v1170_v9  ;;  %v1084_v9 = vrot.slane %v1956_v60, %v324_v63 }
0x14c5   :  { %v1176_v11 = vadd.f32 %v1174_v8, %v1765_v5  ;;  %v930_v8 = vrot.slane %v1933_v17, %v324_v63 }
0x14c6   :  { %v1408_v12 = vmul.f32 -1.442695, %v1205_v10 }
0x14c7   :  { %v1406_v13 = vmul.f32 -1.442695, %v1176_v11 }
0x14c8   :  { %1636 = vpow2.f32 %v1408_v12 }
0x14c9   :  { %1638 = vpow2.f32 %v1406_v13 }
0x14d2   :  { %v1637_v14 = vpop.eup %1636 }
0x14d3   :  { %v1639_v22 = vpop.eup %1638  ;;  %v1209_v15 = vadd.f32 1.0, %v1637_v14 }
0x14d4   :  { %v1180_v16 = vadd.f32 1.0, %v1639_v22 }
0x14d5   :  { %1640 = vrcp.f32 %v1209_v15 }
0x14d6   :  { %1642 = vrcp.f32 %v1180_v16 }
0x14df   :  { %v1641_v19 = vpop.eup %1640 }
0x14e0   :  { %v1643_v21 = vpop.eup %1642  ;;  %v1212_v23 = vmul.f32 2.0, %v1641_v19  ;;  %v1214_v34 = vmul.f32 %v1641_v19, %v1070_v53 }
0x14e1   :  { %v1183_v18 = vmul.f32 2.0, %v1643_v21  ;;  %v1188_v44 = vmul.f32 %v1643_v21, %v1186_v31 }
0x14e2   :  { %v1409_v24 = vadd.f32 -1.0, %v1212_v23 }
0x14e3   :  { %v1407_v25 = vadd.f32 -1.0, %v1183_v18 }
0x14e4   :  { %1216 = vrot.lane.b32.xlu0 %v1409_v24, %s1705_s0 }
0x14e5   :  { %1190 = vrot.lane.b32.xlu1 %v1407_v25, %s1705_s0 }
0x1556   :  { %v1217_v5 = vpop.permute.xlu0 %1216 }
0x1557   :  { %v1219_v28 = vmul.f32 %v1641_v19, %v1217_v5  ;;  %v1191_v29 = vpop.permute.xlu1 %1190 }
0x1558   :  { %v1193_v30 = vmul.f32 %v1643_v21, %v1191_v29 }
0x1559   :  { %1221 = vrot.lane.b32.xlu0 %v1219_v28, %s1706_s1 }
0x155a   :  { %1195 = vrot.lane.b32.xlu1 %v1193_v30, %s1706_s1 }
0x15cb   :  { %v1222_v26 = vpop.permute.xlu0 %1221 }
0x15cc   :  { %v1224_v35 = vadd.f32 %v1222_v26, %v1214_v34  ;;  %v1196_v27 = vpop.permute.xlu1 %1195 }
0x15cd   :  { %v1198_v32 = vadd.f32 %v1196_v27, %v1188_v44 }
0x15ce   :  { %1644 = vtanh.f32 %v1224_v35 }
0x15cf   :  { %1646 = vtanh.f32 %v1198_v32 }
0x15d8   :  { %v1645_v33 = vpop.eup %1644 }
0x15d9   :  { %v1647_v36 = vpop.eup %1646  ;;  %1227 = vrot.lane.b32.xlu0 %v1645_v33, %s1705_s0 }
0x15da   :  { %1201 = vrot.lane.b32.xlu1 %v1647_v36, %s1705_s0 }
0x164b   :  { %v1228_v38 = vpop.permute.xlu0 %1227 }
0x164c   :  { %v1971_v39 = vmul.f32 %v1641_v19, %v1228_v38  ;;  %v1202_v43 = vpop.permute.xlu1 %1201 }
0x164d   :  { %v1204_v7 = vmul.f32 %v1643_v21, %v1202_v43 }
0x164e   :  { %v1247_v37 = vrot.slane %v1971_v39, 2 }
0x164f   :  { %1244 = vrot.lane.b32.xlu0 %v1204_v7, %s1706_s1 }
0x1650   :  { %1248 = vrot.lane.b32.xlu1 %v1247_v37, %s1705_s0 }
0x16c1   :  { %v1245_v41 = vpop.permute.xlu0 %1244 }
0x16c2   :  { %v1249_v42 = vpop.permute.xlu1 %1248 }
0x16c3   :  { %v1251_v45 = vsel %vm177_vm2, %v1245_v41, %v1249_v42 }
0x16c4   :  { %v1253_v46 = vrot.slane %v1251_v45, 6 }
0x16c6   :  { %1410 = vmatmul.mubr.msk.f32.vlgmr.msra.gmra.mrb[8].mxu0 %vm179_vm3, %v1253_v46 }
0x1799   :  { %v1322_v47 = vpop.f32.mrb[8].mxu0 }
0x179a   :  { %v1323_v48 = vpop.f32.mrb[9].mxu0 }
0x179b   :  { %v1326_v50 = vadd.f32 %v1827_v49, %v1323_v48  ;;  %v480_v49 = vrot.slane %v1862_v4, %v324_v63  ;;  %v635_v4 = vrot.slane %v1886_v55, %v324_v63  ;;  %v1238_v55 = vrot.slane %v1971_v39, %v324_v63 }
0x179d   :  { %v1411_v51 = vmul.f32 -1.442695, %v1326_v50 }
0x179f   :  { %1648 = vpow2.f32 %v1411_v51 }
0x17a9   :  { %v1649_v52 = vpop.eup %1648 }
0x17aa   :  { %v1330_v53 = vadd.f32 1.0, %v1649_v52 }
0x17ac   :  { %1650 = vrcp.f32 %v1330_v53 }
0x17b6   :  { %v1651_v61 = vpop.eup %1650 }
0x17b7   :  { %v1333_v62 = vmul.f32 2.0, %v1651_v61  ;;  %v1335_v10 = vmul.f32 %v1651_v61, %v1224_v35 }
0x17b9   :  { %v1412_v0 = vadd.f32 -1.0, %v1333_v62 }
0x17bb   :  { %1337 = vrot.lane.b32.xlu0 %v1412_v0, %s1705_s0 }
0x17bf   :  { %326 = vrot.lane.b32.xlu0 %v325_v1, %s1706_s1 }
0x17c3   :  { %481 = vrot.lane.b32.xlu0 %v480_v49, %s1705_s0 }
0x182d   :  { %v1338_v2 = vpop.permute.xlu0 %1337 }
0x182e   :  { %v1340_v3 = vmul.f32 %v1651_v61, %v1338_v2 }
0x1830   :  { %1342 = vrot.lane.b32.xlu1 %v1340_v3, %s1706_s1 }
0x1831   :  { %v327_v6 = vpop.permute.xlu0 %326 }
0x1832   :  { %330 = vst.msk [vmem:[#allocation5] sm:$0x3] %vm329_vm4, %v327_v6 }
0x1834   :  { %931 = vrot.lane.b32.xlu1 %v930_v8, %s1706_s1 }
0x1835   :  { %v482_v20 = vpop.permute.xlu0 %481 }
0x1836   :  { %485 = vst.msk [vmem:[#allocation5] sm:$0x3] %vm484_vm5, %v482_v20 }
0x1838   :  { %1085 = vrot.lane.b32.xlu1 %v1084_v9, %s1705_s0 }
0x183c   :  { %636 = vrot.lane.b32.xlu1 %v635_v4, %s1709_s4 }
0x18a2   :  { %v1343_v11 = vpop.permute.xlu1 %1342 }
0x18a3   :  { %v1345_v12 = vadd.f32 %v1343_v11, %v1335_v10 }
0x18a5   :  { %1652 = vtanh.f32 %v1345_v12 }
0x18a6   :  { %v932_v17 = vpop.permute.xlu1 %931 }
0x18a7   :  { %934 = vst.msk [vmem:[#allocation5 + $0x2] sm:$0x3] %vm329_vm4, %v932_v17 }
0x18aa   :  { %v1086_v13 = vpop.permute.xlu1 %1085 }
0x18ab   :  { %1088 = vst.msk [vmem:[#allocation5 + $0x2] sm:$0x3] %vm484_vm5, %v1086_v13 }
0x18ae   :  { %v637_v60 = vpop.permute.xlu1 %636 }
0x18af   :  { %v1653_v14 = vpop.eup %1652  ;;  %640 = vst.msk [vmem:[#allocation5] sm:$0x3] %vm639_vm6, %v637_v60 }
0x18b0   :  { %1348 = vrot.lane.b32.xlu0 %v1653_v14, %s1705_s0  ;;  %781 = vst.msk [vmem:[#allocation5] sm:$0x3] %vm780_vm7, %v1910_v40 }
0x18b4   :  { %1239 = vrot.lane.b32.xlu0 %v1238_v55, %s1709_s4 }
0x1922   :  { %v1349_v22 = vpop.permute.xlu0 %1348 }
0x1923   :  { %v1351_v15 = vmul.f32 %v1651_v61, %v1349_v22 }
0x1926   :  { %v1240_v16 = vpop.permute.xlu0 %1239 }
0x1927   :  { %1242 = vst.msk [vmem:[#allocation5 + $0x2] sm:$0x3] %vm639_vm6, %v1240_v16 }
0x1928   :  { %1352 = vst.msk [vmem:[#allocation5 + $0x2] sm:$0x3] %vm780_vm7, %v1351_v15 }
0x1929   :  { %1687 = shalt.err (!%p1684_p12)
}
0x192a   :  { %s1688_s20 = scalar_lea.hbm %s2014_s5, 64 }
0x192b   :  { %p1689_p13 = scmp.ne.s32.totalorder %s2014_s5, %s1688_s20  ;;  %p1692_p0 = scmp.lt.u32.totalorder %s1688_s20, %s2014_s5 }
0x192d   :  { %p1694_p1 = pnand %p1692_p0, %p1689_p13 }
0x192f   :  { %1697 = shalt.err (!%p1694_p1)
}
0x1930   :  { %1362 = dma.vmem_to_hbm [thread:$0]  %s1360_s16, 64, %s2014_s5, [#allocation4]  }
0x1931   :  { %1700 = dma.done.wait [#allocation4], 64  }
0x1932   :  { %1701 = vsyncadd [#allocation4], 4294967232 }
0x1933   :  { %1366 = vsyncpa [#allocation3], 1 }
0x1934   :  { %1367 = vsyncpa [#allocation4], 1 }

</bundles_post_ra>
